<compile_context>
chip_gen: v7x
topology: tpu7x:2x2x1
jax: 0.10.0
libtpu: 0.0.40
codegen_flags: <defaults>
</compile_context>

<pallas_src>
import functools

import jax
import jax.numpy as jnp
from jax.experimental import pallas as pl
from jax.experimental.pallas import tpu as pltpu

# MXU input dtype (f32 accumulation everywhere).  Flip to jnp.float32 for
# bit-closer parity with the f32 PyTorch reference.
MXU_DTYPE = jnp.bfloat16


# ----------------------------------------------------------------------------
# Pallas kernel: the whole FFT-block stack, one layer per grid step.
# ----------------------------------------------------------------------------
def _encoder_stack_kernel(
    x_ref, mask_ref,
    wq_ref, bq_ref, wk_ref, bk_ref, wv_ref, bv_ref,
    wo_ref, bo_ref, ln1g_ref, ln1b_ref,
    w1_ref, b1_ref, w2_ref, b2_ref, ln2g_ref, ln2b_ref,
    o_ref,
    *scratch,
    n_head, d_k, k1, k2, B, T,
):
    l = pl.program_id(0)
    D = o_ref.shape[-1]
    N = B * T
    eps = 1e-5
    p1 = (k1 - 1) // 2      # 'same' padding (odd kernel sizes)
    p2 = (k2 - 1) // 2

    si = 0
    pad1_ref = None
    pad2_ref = None
    if p1 > 0:
        pad1_ref = scratch[si]; si += 1
    if p2 > 0:
        pad2_ref = scratch[si]; si += 1

    # Layer 0: seed the resident activation block from the embedded input and
    # zero the conv halo scratches once (their edge rows are never rewritten).
    @pl.when(l == 0)
    def _init():
        o_ref[...] = x_ref[...]
        if pad1_ref is not None:
            pad1_ref[...] = jnp.zeros(pad1_ref.shape, pad1_ref.dtype)
        if pad2_ref is not None:
            pad2_ref[...] = jnp.zeros(pad2_ref.shape, pad2_ref.dtype)

    x2 = o_ref[...].reshape(N, D)        # (N, D) f32, VMEM-resident activations
    mask2 = mask_ref[...]                # (N, 1) f32 non-pad mask

    def layer_norm(v, g_ref, b_ref):
        # Single-pass fused stats: E[x] and E[x^2].
        s1 = jnp.sum(v, axis=-1, keepdims=True)
        s2 = jnp.sum(v * v, axis=-1, keepdims=True)
        mu = s1 * (1.0 / D)
        var = s2 * (1.0 / D) - mu * mu
        return (v - mu) * jax.lax.rsqrt(var + eps) * g_ref[0] + b_ref[0]

    # ---------------- multi-head self-attention (post-LN, residual) ---------
    xb = x2.astype(MXU_DTYPE)
    scale = 1.0 / (float(d_k) ** 0.5)
    # Scale folded into Q (cheaper than scaling the (B,T,T) scores).
    qp = (jnp.dot(xb, wq_ref[0], preferred_element_type=jnp.float32) + bq_ref[0]) * scale
    kp = jnp.dot(xb, wk_ref[0], preferred_element_type=jnp.float32) + bk_ref[0]
    vp = jnp.dot(xb, wv_ref[0], preferred_element_type=jnp.float32) + bv_ref[0]
    q3 = qp.reshape(B, T, D).astype(MXU_DTYPE)
    k3 = kp.reshape(B, T, D).astype(MXU_DTYPE)
    v3 = vp.reshape(B, T, D).astype(MXU_DTYPE)

    # Output projection accumulated per head (Wo pre-split to (H, d_k, D) in
    # the wrapper) -> no jnp.concatenate, no explicit K transpose.
    # NOTE: per reference forward, padded keys are NOT masked inside softmax
    # (slf_attn_mask is computed in encoder_forward but never passed).
    attn_out = jnp.broadcast_to(bo_ref[0], (N, D)).astype(jnp.float32)
    for h in range(n_head):
        sl = slice(h * d_k, (h + 1) * d_k)
        s = jnp.einsum("bqd,bkd->bqk", q3[:, :, sl], k3[:, :, sl],
                       preferred_element_type=jnp.float32)          # (B, T, T)
        m = jnp.max(s, axis=-1, keepdims=True)
        e = jnp.exp(s - m)
        p = e * pl.reciprocal(jnp.sum(e, axis=-1, keepdims=True), approx=True)
        ctx = jnp.einsum("bqk,bkd->bqd", p.astype(MXU_DTYPE), v3[:, :, sl],
                         preferred_element_type=jnp.float32)        # (B, T, d_k)
        attn_out = attn_out + jnp.dot(
            ctx.reshape(N, d_k).astype(MXU_DTYPE), wo_ref[0, h],
            preferred_element_type=jnp.float32)

    y2 = layer_norm(attn_out + x2, ln1g_ref, ln1b_ref) * mask2      # non_pad_mask

    # ---------------- position-wise conv FFN (conv -> relu -> conv) ---------
    def conv1d_same(v, w_ref_, b_ref_, ksz, pad, pad_ref_):
        # v: (N, Cin) f32; w_ref_: (1, ksz, Cin, Cout); halo scratch holds the
        # zero-padded time axis so no per-tap concatenate is needed.
        cin = v.shape[-1]
        cout = w_ref_.shape[-1]
        acc = jnp.broadcast_to(b_ref_[0], (N, cout)).astype(jnp.float32)  # seed with bias
        if pad == 0:      # ksz == 1: plain matmul
            acc = acc + jnp.dot(v.astype(MXU_DTYPE), w_ref_[0, 0],
                                preferred_element_type=jnp.float32)
        else:
            pad_ref_[:, pad:pad + T, :] = v.reshape(B, T, cin).astype(MXU_DTYPE)
            for j in range(ksz):
                xs = pad_ref_[:, j:j + T, :].reshape(N, cin)
                acc = acc + jnp.dot(xs, w_ref_[0, j],
                                    preferred_element_type=jnp.float32)
        return acc

    h1 = jnp.maximum(conv1d_same(y2, w1_ref, b1_ref, k1, p1, pad1_ref), 0.0)
    z2 = conv1d_same(h1, w2_ref, b2_ref, k2, p2, pad2_ref)
    z2 = layer_norm(z2 + y2, ln2g_ref, ln2b_ref) * mask2

    o_ref[...] = z2.reshape(B, T, D)     # stays VMEM-resident until last layer


def encoder_fused(x, mask2, stacked, *, n_head, d_k, k1, k2):
    """x: (B, T, D) f32 embedded input; mask2: (B*T, 1) f32; stacked: list of
    (L, ...) stacked per-layer parameters."""
    B, T, D = x.shape
    N = B * T
    L = stacked[0].shape[0]
    F = stacked[10].shape[-1]
    p1 = (k1 - 1) // 2
    p2 = (k2 - 1) // 2
    assert k1 % 2 == 1 and k2 % 2 == 1, "odd conv kernels assumed ('same' padding)"
    assert D % n_head == 0 and d_k * n_head == D

    def _layer_spec(p):
        # One layer's slice per grid step -> weights streamed (double-buffered).
        nrest = p.ndim - 1
        return pl.BlockSpec((1,) + tuple(p.shape[1:]),
                            lambda l, nrest=nrest: (l,) + (0,) * nrest)

    in_specs = (
        [pl.BlockSpec((B, T, D), lambda l: (0, 0, 0)),   # embedded input (resident)
         pl.BlockSpec((N, 1), lambda l: (0, 0))]         # non-pad mask (resident)
        + [_layer_spec(p) for p in stacked]
    )

    scratch_shapes = []
    if p1 > 0:
        scratch_shapes.append(pltpu.VMEM((B, T + 2 * p1, D), MXU_DTYPE))
    if p2 > 0:
        scratch_shapes.append(pltpu.VMEM((B, T + 2 * p2, F), MXU_DTYPE))

    kernel = functools.partial(
        _encoder_stack_kernel, n_head=n_head, d_k=d_k, k1=k1, k2=k2, B=B, T=T)

    return pl.pallas_call(
        kernel,
        out_shape=jax.ShapeDtypeStruct((B, T, D), jnp.float32),
        grid=(L,),                       # layer axis: serial (activation carry)
        in_specs=in_specs,
        out_specs=pl.BlockSpec((B, T, D), lambda l: (0, 0, 0)),
        scratch_shapes=scratch_shapes,
        compiler_params=pltpu.CompilerParams(
            # Layers are sequential -> "arbitrary".  (No batch grid axis is
            # kept; if batch were tiled it would be marked "parallel" for
            # v7x's two TensorCores.)
            dimension_semantics=("arbitrary",),
            vmem_limit_bytes=48 * 1024 * 1024,   # safe on v5e/v6e/v7x
        ),
    )(x, mask2, *stacked)


# ----------------------------------------------------------------------------
# Parameter construction (deterministic, synthetic) + stacking for the kernel.
# ----------------------------------------------------------------------------
def make_params(key, n_layers, D, F, kernels, vocab_size, n_position, pad_token):
    keys = jax.random.split(key, 2 + n_layers)

    word_emb = 0.02 * jax.random.normal(keys[0], (vocab_size, D), jnp.float32)
    word_emb = word_emb.at[pad_token].set(0.0)            # padding_idx
    pos_emb = 0.02 * jax.random.normal(keys[1], (n_position, D), jnp.float32)
    pos_emb = pos_emb.at[pad_token].set(0.0)              # padding_idx

    k1, k2 = kernels
    layers = []
    for li in range(n_layers):
        lk = jax.random.split(keys[2 + li], 8)
        s = 0.05
        layer = [
            s * jax.random.normal(lk[0], (D, D), jnp.float32),      # Wq
            jnp.zeros((1, D), jnp.float32),                         # bq
            s * jax.random.normal(lk[1], (D, D), jnp.float32),      # Wk
            jnp.zeros((1, D), jnp.float32),                         # bk
            s * jax.random.normal(lk[2], (D, D), jnp.float32),      # Wv
            jnp.zeros((1, D), jnp.float32),                         # bv
            s * jax.random.normal(lk[3], (D, D), jnp.float32),      # Wo
            jnp.zeros((1, D), jnp.float32),                         # bo
            jnp.ones((1, D), jnp.float32),                          # ln1 gamma
            jnp.zeros((1, D), jnp.float32),                         # ln1 beta
            s * jax.random.normal(lk[4], (k1, D, F), jnp.float32),  # conv1 taps (k, Cin, Cout)
            jnp.zeros((1, F), jnp.float32),                         # conv1 bias
            s * jax.random.normal(lk[5], (k2, F, D), jnp.float32),  # conv2 taps
            jnp.zeros((1, D), jnp.float32),                         # conv2 bias
            jnp.ones((1, D), jnp.float32),                          # ln2 gamma
            jnp.zeros((1, D), jnp.float32),                         # ln2 beta
        ]
        layers.append(layer)
    return word_emb, pos_emb, layers


def stack_layer_params(layers, n_head, d_k):
    """Stack per-layer params on a leading L axis; weight matrices in MXU dtype
    (bf16 halves the per-layer weight DMA), biases/LN params in f32; Wo split
    per head to (L, H, d_k, D) so the kernel never concatenates heads."""
    L = len(layers)

    def stk(i):
        return jnp.stack([layers[li][i] for li in range(L)], axis=0)

    wq = stk(0).astype(MXU_DTYPE)
    bq = stk(1)
    wk = stk(2).astype(MXU_DTYPE)
    bk = stk(3)
    wv = stk(4).astype(MXU_DTYPE)
    bv = stk(5)
    wo = stk(6)
    wo = wo.reshape(L, n_head, d_k, wo.shape[-1]).astype(MXU_DTYPE)
    bo = stk(7)
    ln1g, ln1b = stk(8), stk(9)
    w1 = stk(10).astype(MXU_DTYPE)
    b1 = stk(11)
    w2 = stk(12).astype(MXU_DTYPE)
    b2 = stk(13)
    ln2g, ln2b = stk(14), stk(15)
    return [wq, bq, wk, bk, wv, bv, wo, bo, ln1g, ln1b,
            w1, b1, w2, b2, ln2g, ln2b]


# ----------------------------------------------------------------------------
# Encoder forward (glue in JAX, hot path in a single fused Pallas kernel).
# ----------------------------------------------------------------------------
def encoder_forward(src_seq, src_pos, word_emb, pos_emb, stacked,
                    *, pad_token, n_head, d_k, kernels):
    B, T = src_seq.shape
    # get_attn_key_pad_mask — computed to mirror the reference forward, but the
    # reference FFTBlock call only receives non_pad_mask, so it is unused here.
    _slf_attn_mask = jnp.broadcast_to(
        (src_seq == pad_token)[:, None, :], (B, T, T))

    non_pad_mask = (src_seq != pad_token).astype(jnp.float32)       # (B, T)
    mask2 = non_pad_mask.reshape(B * T, 1)                          # (B*T, 1)

    # Embedding gathers (glue).
    enc_output = jnp.take(word_emb, src_seq, axis=0) + jnp.take(pos_emb, src_pos, axis=0)
    enc_output = enc_output.astype(jnp.float32)

    k1, k2 = kernels
    return encoder_fused(enc_output, mask2, stacked,
                         n_head=n_head, d_k=d_k, k1=k1, k2=k2)


# ----------------------------------------------------------------------------
if __name__ == "__main__":
    # Small, self-consistent model config.
    PAD = 0
    vocab_size = 50
    max_seq_len = 32
    n_position = max_seq_len + 1
    encoder_dim = 32
    encoder_n_layer = 2
    encoder_head = 2
    encoder_filter = 64
    fft_conv1d_kernels = (3, 1)
    d_k = encoder_dim // encoder_head

    B, T = 2, 8

    key = jax.random.PRNGKey(0)
    pkey, skey = jax.random.split(key)
    word_emb, pos_emb, layers = make_params(
        pkey, encoder_n_layer, encoder_dim, encoder_filter,
        fft_conv1d_kernels, vocab_size, n_position, PAD)
    stacked = stack_layer_params(layers, encoder_head, d_k)

    # Deterministic inputs: two sequences of length 8 and 5 (rest padded).
    lengths = jnp.array([8, 5], dtype=jnp.int32)
    ids = jax.random.randint(skey, (B, T), 1, vocab_size, dtype=jnp.int32)
    tpos = jnp.arange(T, dtype=jnp.int32)[None, :]
    valid = tpos < lengths[:, None]
    src_seq = jnp.where(valid, ids, PAD)                 # (B, T) int32
    src_pos = jnp.where(valid, tpos + 1, PAD)            # (B, T) int32, 1-based positions

    out = encoder_forward(src_seq, src_pos, word_emb, pos_emb, stacked,
                          pad_token=PAD, n_head=encoder_head, d_k=d_k,
                          kernels=fft_conv1d_kernels)
    out = jax.block_until_ready(out)
    assert out.shape == (B, T, encoder_dim)
    assert bool(jnp.all(jnp.isfinite(out)))
    print("KERNEL_OK")
</pallas_src>

<mosaic_0001>
module attributes {stable_mosaic.version = 11 : i64} {
  func.func @_encoder_stack_kernel(%arg0: i32, %arg1: memref<2x8x32xf32, #tpu.memory_space<vmem>>, %arg2: memref<16x1xf32, #tpu.memory_space<vmem>>, %arg3: memref<1x32x32xbf16, #tpu.memory_space<vmem>>, %arg4: memref<1x1x32xf32, #tpu.memory_space<vmem>>, %arg5: memref<1x32x32xbf16, #tpu.memory_space<vmem>>, %arg6: memref<1x1x32xf32, #tpu.memory_space<vmem>>, %arg7: memref<1x32x32xbf16, #tpu.memory_space<vmem>>, %arg8: memref<1x1x32xf32, #tpu.memory_space<vmem>>, %arg9: memref<1x2x16x32xbf16, #tpu.memory_space<vmem>>, %arg10: memref<1x1x32xf32, #tpu.memory_space<vmem>>, %arg11: memref<1x1x32xf32, #tpu.memory_space<vmem>>, %arg12: memref<1x1x32xf32, #tpu.memory_space<vmem>>, %arg13: memref<1x3x32x64xbf16, #tpu.memory_space<vmem>>, %arg14: memref<1x1x64xf32, #tpu.memory_space<vmem>>, %arg15: memref<1x1x64x32xbf16, #tpu.memory_space<vmem>>, %arg16: memref<1x1x32xf32, #tpu.memory_space<vmem>>, %arg17: memref<1x1x32xf32, #tpu.memory_space<vmem>>, %arg18: memref<1x1x32xf32, #tpu.memory_space<vmem>>, %arg19: memref<2x8x32xf32, #tpu.memory_space<vmem>>, %arg20: memref<2x10x32xbf16, #tpu.memory_space<vmem>>) attributes {dimension_semantics = [#tpu.dimension_semantics<arbitrary>], iteration_bounds = array<i64: 2>, scalar_prefetch = 0 : i64, scratch_operands = 1 : i64, tpu.core_type = #tpu.core_type<tc>, window_params = [{pipeline_mode = #tpu.pipeline_mode<synchronous>, transform_indices = @transform_0, window_bounds = array<i64: 2, 8, 32>}, {pipeline_mode = #tpu.pipeline_mode<synchronous>, transform_indices = @transform_1, window_bounds = array<i64: 16, 1>}, {transform_indices = @transform_2, window_bounds = array<i64: 1, 32, 32>}, {transform_indices = @transform_3, window_bounds = array<i64: 1, 1, 32>}, {transform_indices = @transform_4, window_bounds = array<i64: 1, 32, 32>}, {transform_indices = @transform_5, window_bounds = array<i64: 1, 1, 32>}, {transform_indices = @transform_6, window_bounds = array<i64: 1, 32, 32>}, {transform_indices = @transform_7, window_bounds = array<i64: 1, 1, 32>}, {transform_indices = @transform_8, window_bounds = array<i64: 1, 2, 16, 32>}, {transform_indices = @transform_9, window_bounds = array<i64: 1, 1, 32>}, {transform_indices = @transform_10, window_bounds = array<i64: 1, 1, 32>}, {transform_indices = @transform_11, window_bounds = array<i64: 1, 1, 32>}, {transform_indices = @transform_12, window_bounds = array<i64: 1, 3, 32, 64>}, {transform_indices = @transform_13, window_bounds = array<i64: 1, 1, 64>}, {transform_indices = @transform_14, window_bounds = array<i64: 1, 1, 64, 32>}, {transform_indices = @transform_15, window_bounds = array<i64: 1, 1, 32>}, {transform_indices = @transform_16, window_bounds = array<i64: 1, 1, 32>}, {transform_indices = @transform_17, window_bounds = array<i64: 1, 1, 32>}, {pipeline_mode = #tpu.pipeline_mode<synchronous>, transform_indices = @transform_18, window_bounds = array<i64: 2, 8, 32>}]} {
    %c0_i32 = arith.constant 0 : i32
    %0 = arith.cmpi eq, %arg0, %c0_i32 : i32
    %1 = arith.extui %0 : i1 to i32
    %c0_i32_0 = arith.constant 0 : i32
    %2 = arith.cmpi ne, %1, %c0_i32_0 : i32
    scf.if %2 {
      %c0_109 = arith.constant 0 : index
      %c0_110 = arith.constant 0 : index
      %c0_111 = arith.constant 0 : index
      %180 = vector.load %arg1[%c0_109, %c0_110, %c0_111] : memref<2x8x32xf32, #tpu.memory_space<vmem>>, vector<2x8x32xf32>
      %c0_112 = arith.constant 0 : index
      %c0_113 = arith.constant 0 : index
      %c0_114 = arith.constant 0 : index
      %181 = vector.load %arg19[%c0_112, %c0_113, %c0_114] : memref<2x8x32xf32, #tpu.memory_space<vmem>>, vector<2x8x32xf32>
      tpu.vector_store %arg19[%c0_112, %c0_113, %c0_114], %180 {strides = array<i32>} : memref<2x8x32xf32, #tpu.memory_space<vmem>>, vector<2x8x32xf32>,
      %cst_115 = arith.constant 0.000000e+00 : bf16
      %182 = vector.broadcast %cst_115 : bf16 to vector<2x10x32xbf16>
      %c0_116 = arith.constant 0 : index
      %c0_117 = arith.constant 0 : index
      %c0_118 = arith.constant 0 : index
      %183 = vector.load %arg20[%c0_116, %c0_117, %c0_118] : memref<2x10x32xbf16, #tpu.memory_space<vmem>>, vector<2x10x32xbf16>
      tpu.vector_store %arg20[%c0_116, %c0_117, %c0_118], %182 {strides = array<i32>} : memref<2x10x32xbf16, #tpu.memory_space<vmem>>, vector<2x10x32xbf16>,
    } else {
    }
    %c0 = arith.constant 0 : index
    %c0_1 = arith.constant 0 : index
    %c0_2 = arith.constant 0 : index
    %3 = vector.load %arg19[%c0, %c0_1, %c0_2] : memref<2x8x32xf32, #tpu.memory_space<vmem>>, vector<2x8x32xf32>
    %4 = vector.shape_cast %3 : vector<2x8x32xf32> to vector<16x32xf32>
    %c0_3 = arith.constant 0 : index
    %c0_4 = arith.constant 0 : index
    %5 = vector.load %arg2[%c0_3, %c0_4] : memref<16x1xf32, #tpu.memory_space<vmem>>, vector<16x1xf32>
    %6 = arith.truncf %4 : vector<16x32xf32> to vector<16x32xbf16>
    %c0_5 = arith.constant 0 : index
    %c0_6 = arith.constant 0 : index
    %c0_7 = arith.constant 0 : index
    %7 = vector.load %arg3[%c0_5, %c0_6, %c0_7] : memref<1x32x32xbf16, #tpu.memory_space<vmem>>, vector<1x32x32xbf16>
    %8 = vector.shape_cast %7 : vector<1x32x32xbf16> to vector<32x32xbf16>
    %cst = arith.constant dense<0.000000e+00> : vector<16x32xf32>
    %9 = tpu.matmul %6, %8, %cst {dimension_numbers = #tpu.dot_dimension_numbers<[1], [0], [0], [1], [0, 0, 1, 1], [], []>} : vector<16x32xbf16>, vector<32x32xbf16>, vector<16x32xf32> -> vector<16x32xf32>
    %c0_8 = arith.constant 0 : index
    %c0_9 = arith.constant 0 : index
    %c0_10 = arith.constant 0 : index
    %10 = vector.load %arg4[%c0_8, %c0_9, %c0_10] : memref<1x1x32xf32, #tpu.memory_space<vmem>>, vector<1x1x32xf32>
    %11 = vector.shape_cast %10 : vector<1x1x32xf32> to vector<1x32xf32>
    %12 = vector.broadcast %11 : vector<1x32xf32> to vector<16x32xf32>
    %13 = arith.addf %9, %12 : vector<16x32xf32>
    %cst_11 = arith.constant 2.500000e-01 : f32
    %14 = vector.broadcast %cst_11 : f32 to vector<16x32xf32>
    %15 = arith.mulf %13, %14 : vector<16x32xf32>
    %c0_12 = arith.constant 0 : index
    %c0_13 = arith.constant 0 : index
    %c0_14 = arith.constant 0 : index
    %16 = vector.load %arg5[%c0_12, %c0_13, %c0_14] : memref<1x32x32xbf16, #tpu.memory_space<vmem>>, vector<1x32x32xbf16>
    %17 = vector.shape_cast %16 : vector<1x32x32xbf16> to vector<32x32xbf16>
    %cst_15 = arith.constant dense<0.000000e+00> : vector<16x32xf32>
    %18 = tpu.matmul %6, %17, %cst_15 {dimension_numbers = #tpu.dot_dimension_numbers<[1], [0], [0], [1], [0, 0, 1, 1], [], []>} : vector<16x32xbf16>, vector<32x32xbf16>, vector<16x32xf32> -> vector<16x32xf32>
    %c0_16 = arith.constant 0 : index
    %c0_17 = arith.constant 0 : index
    %c0_18 = arith.constant 0 : index
    %19 = vector.load %arg6[%c0_16, %c0_17, %c0_18] : memref<1x1x32xf32, #tpu.memory_space<vmem>>, vector<1x1x32xf32>
    %20 = vector.shape_cast %19 : vector<1x1x32xf32> to vector<1x32xf32>
    %21 = vector.broadcast %20 : vector<1x32xf32> to vector<16x32xf32>
    %22 = arith.addf %18, %21 : vector<16x32xf32>
    %c0_19 = arith.constant 0 : index
    %c0_20 = arith.constant 0 : index
    %c0_21 = arith.constant 0 : index
    %23 = vector.load %arg7[%c0_19, %c0_20, %c0_21] : memref<1x32x32xbf16, #tpu.memory_space<vmem>>, vector<1x32x32xbf16>
    %24 = vector.shape_cast %23 : vector<1x32x32xbf16> to vector<32x32xbf16>
    %cst_22 = arith.constant dense<0.000000e+00> : vector<16x32xf32>
    %25 = tpu.matmul %6, %24, %cst_22 {dimension_numbers = #tpu.dot_dimension_numbers<[1], [0], [0], [1], [0, 0, 1, 1], [], []>} : vector<16x32xbf16>, vector<32x32xbf16>, vector<16x32xf32> -> vector<16x32xf32>
    %c0_23 = arith.constant 0 : index
    %c0_24 = arith.constant 0 : index
    %c0_25 = arith.constant 0 : index
    %26 = vector.load %arg8[%c0_23, %c0_24, %c0_25] : memref<1x1x32xf32, #tpu.memory_space<vmem>>, vector<1x1x32xf32>
    %27 = vector.shape_cast %26 : vector<1x1x32xf32> to vector<1x32xf32>
    %28 = vector.broadcast %27 : vector<1x32xf32> to vector<16x32xf32>
    %29 = arith.addf %25, %28 : vector<16x32xf32>
    %30 = vector.shape_cast %15 : vector<16x32xf32> to vector<2x8x32xf32>
    %31 = arith.truncf %30 : vector<2x8x32xf32> to vector<2x8x32xbf16>
    %32 = vector.shape_cast %22 : vector<16x32xf32> to vector<2x8x32xf32>
    %33 = arith.truncf %32 : vector<2x8x32xf32> to vector<2x8x32xbf16>
    %34 = vector.shape_cast %29 : vector<16x32xf32> to vector<2x8x32xf32>
    %35 = arith.truncf %34 : vector<2x8x32xf32> to vector<2x8x32xbf16>
    %c0_26 = arith.constant 0 : index
    %c0_27 = arith.constant 0 : index
    %c0_28 = arith.constant 0 : index
    %36 = vector.load %arg10[%c0_26, %c0_27, %c0_28] : memref<1x1x32xf32, #tpu.memory_space<vmem>>, vector<1x1x32xf32>
    %37 = vector.shape_cast %36 : vector<1x1x32xf32> to vector<1x32xf32>
    %38 = vector.shape_cast %37 : vector<1x32xf32> to vector<1x32xf32>
    %39 = vector.broadcast %38 : vector<1x32xf32> to vector<16x32xf32>
    %40 = vector.extract_strided_slice %31 {offsets = [0, 0, 0], sizes = [2, 8, 16], strides = [1, 1, 1]} : vector<2x8x32xbf16> to vector<2x8x16xbf16>
    %41 = vector.extract_strided_slice %33 {offsets = [0, 0, 0], sizes = [2, 8, 16], strides = [1, 1, 1]} : vector<2x8x32xbf16> to vector<2x8x16xbf16>
    "tpu.trace_start"() <{level = 10 : i32, message = "bqd,bkd->bqk"}> : () -> ()
    %cst_29 = arith.constant dense<0.000000e+00> : vector<2x8x8xf32>
    %42 = tpu.matmul %40, %41, %cst_29 {dimension_numbers = #tpu.dot_dimension_numbers<[2], [2], [1], [1], [0, 0, 0, 1, 1, 1], [0], [0]>} : vector<2x8x16xbf16>, vector<2x8x16xbf16>, vector<2x8x8xf32> -> vector<2x8x8xf32>
    "tpu.trace_stop"() : () -> ()
    %cst_30 = arith.constant dense<0xFF800000> : vector<2x8xf32>
    %43 = vector.multi_reduction <maximumf>, %42, %cst_30 [2] : vector<2x8x8xf32> to vector<2x8xf32>
    %44 = vector.shape_cast %43 : vector<2x8xf32> to vector<2x8x1xf32>
    %45 = vector.broadcast %44 : vector<2x8x1xf32> to vector<2x8x8xf32>
    %46 = arith.subf %42, %45 : vector<2x8x8xf32>
    %47 = math.exp %46 : vector<2x8x8xf32>
    %cst_31 = arith.constant dense<0.000000e+00> : vector<2x8xf32>
    %48 = vector.multi_reduction <add>, %47, %cst_31 [2] : vector<2x8x8xf32> to vector<2x8xf32>
    %49 = vector.shape_cast %48 : vector<2x8xf32> to vector<2x8x1xf32>
    %50 = tpu.reciprocal %49 {approx = true} : vector<2x8x1xf32> -> vector<2x8x1xf32>
    %51 = vector.broadcast %50 : vector<2x8x1xf32> to vector<2x8x8xf32>
    %52 = arith.mulf %47, %51 : vector<2x8x8xf32>
    %53 = arith.truncf %52 : vector<2x8x8xf32> to vector<2x8x8xbf16>
    %54 = vector.extract_strided_slice %35 {offsets = [0, 0, 0], sizes = [2, 8, 16], strides = [1, 1, 1]} : vector<2x8x32xbf16> to vector<2x8x16xbf16>
    "tpu.trace_start"() <{level = 10 : i32, message = "bqk,bkd->bqd"}> : () -> ()
    %cst_32 = arith.constant dense<0.000000e+00> : vector<2x8x16xf32>
    %55 = tpu.matmul %53, %54, %cst_32 {dimension_numbers = #tpu.dot_dimension_numbers<[2], [1], [1], [2], [0, 0, 0, 1, 1, 2], [0], [0]>} : vector<2x8x8xbf16>, vector<2x8x16xbf16>, vector<2x8x16xf32> -> vector<2x8x16xf32>
    "tpu.trace_stop"() : () -> ()
    %56 = vector.shape_cast %55 : vector<2x8x16xf32> to vector<16x16xf32>
    %57 = arith.truncf %56 : vector<16x16xf32> to vector<16x16xbf16>
    %c0_33 = arith.constant 0 : index
    %c0_34 = arith.constant 0 : index
    %c0_35 = arith.constant 0 : index
    %c0_36 = arith.constant 0 : index
    %58 = vector.load %arg9[%c0_33, %c0_34, %c0_35, %c0_36] : memref<1x2x16x32xbf16, #tpu.memory_space<vmem>>, vector<1x1x16x32xbf16>
    %59 = vector.shape_cast %58 : vector<1x1x16x32xbf16> to vector<16x32xbf16>
    %cst_37 = arith.constant dense<0.000000e+00> : vector<16x32xf32>
    %60 = tpu.matmul %57, %59, %cst_37 {dimension_numbers = #tpu.dot_dimension_numbers<[1], [0], [0], [1], [0, 0, 1, 1], [], []>} : vector<16x16xbf16>, vector<16x32xbf16>, vector<16x32xf32> -> vector<16x32xf32>
    %61 = arith.addf %39, %60 : vector<16x32xf32>
    %62 = vector.extract_strided_slice %31 {offsets = [0, 0, 16], sizes = [2, 8, 16], strides = [1, 1, 1]} : vector<2x8x32xbf16> to vector<2x8x16xbf16>
    %63 = vector.extract_strided_slice %33 {offsets = [0, 0, 16], sizes = [2, 8, 16], strides = [1, 1, 1]} : vector<2x8x32xbf16> to vector<2x8x16xbf16>
    "tpu.trace_start"() <{level = 10 : i32, message = "bqd,bkd->bqk"}> : () -> ()
    %cst_38 = arith.constant dense<0.000000e+00> : vector<2x8x8xf32>
    %64 = tpu.matmul %62, %63, %cst_38 {dimension_numbers = #tpu.dot_dimension_numbers<[2], [2], [1], [1], [0, 0, 0, 1, 1, 1], [0], [0]>} : vector<2x8x16xbf16>, vector<2x8x16xbf16>, vector<2x8x8xf32> -> vector<2x8x8xf32>
    "tpu.trace_stop"() : () -> ()
    %cst_39 = arith.constant dense<0xFF800000> : vector<2x8xf32>
    %65 = vector.multi_reduction <maximumf>, %64, %cst_39 [2] : vector<2x8x8xf32> to vector<2x8xf32>
    %66 = vector.shape_cast %65 : vector<2x8xf32> to vector<2x8x1xf32>
    %67 = vector.broadcast %66 : vector<2x8x1xf32> to vector<2x8x8xf32>
    %68 = arith.subf %64, %67 : vector<2x8x8xf32>
    %69 = math.exp %68 : vector<2x8x8xf32>
    %cst_40 = arith.constant dense<0.000000e+00> : vector<2x8xf32>
    %70 = vector.multi_reduction <add>, %69, %cst_40 [2] : vector<2x8x8xf32> to vector<2x8xf32>
    %71 = vector.shape_cast %70 : vector<2x8xf32> to vector<2x8x1xf32>
    %72 = tpu.reciprocal %71 {approx = true} : vector<2x8x1xf32> -> vector<2x8x1xf32>
    %73 = vector.broadcast %72 : vector<2x8x1xf32> to vector<2x8x8xf32>
    %74 = arith.mulf %69, %73 : vector<2x8x8xf32>
    %75 = arith.truncf %74 : vector<2x8x8xf32> to vector<2x8x8xbf16>
    %76 = vector.extract_strided_slice %35 {offsets = [0, 0, 16], sizes = [2, 8, 16], strides = [1, 1, 1]} : vector<2x8x32xbf16> to vector<2x8x16xbf16>
    "tpu.trace_start"() <{level = 10 : i32, message = "bqk,bkd->bqd"}> : () -> ()
    %cst_41 = arith.constant dense<0.000000e+00> : vector<2x8x16xf32>
    %77 = tpu.matmul %75, %76, %cst_41 {dimension_numbers = #tpu.dot_dimension_numbers<[2], [1], [1], [2], [0, 0, 0, 1, 1, 2], [0], [0]>} : vector<2x8x8xbf16>, vector<2x8x16xbf16>, vector<2x8x16xf32> -> vector<2x8x16xf32>
    "tpu.trace_stop"() : () -> ()
    %78 = vector.shape_cast %77 : vector<2x8x16xf32> to vector<16x16xf32>
    %79 = arith.truncf %78 : vector<16x16xf32> to vector<16x16xbf16>
    %c0_42 = arith.constant 0 : index
    %c1 = arith.constant 1 : index
    %c0_43 = arith.constant 0 : index
    %c0_44 = arith.constant 0 : index
    %80 = vector.load %arg9[%c0_42, %c1, %c0_43, %c0_44] : memref<1x2x16x32xbf16, #tpu.memory_space<vmem>>, vector<1x1x16x32xbf16>
    %81 = vector.shape_cast %80 : vector<1x1x16x32xbf16> to vector<16x32xbf16>
    %cst_45 = arith.constant dense<0.000000e+00> : vector<16x32xf32>
    %82 = tpu.matmul %79, %81, %cst_45 {dimension_numbers = #tpu.dot_dimension_numbers<[1], [0], [0], [1], [0, 0, 1, 1], [], []>} : vector<16x16xbf16>, vector<16x32xbf16>, vector<16x32xf32> -> vector<16x32xf32>
    %83 = arith.addf %61, %82 : vector<16x32xf32>
    %84 = arith.addf %83, %4 : vector<16x32xf32>
    %cst_46 = arith.constant dense<0.000000e+00> : vector<16xf32>
    %85 = vector.multi_reduction <add>, %84, %cst_46 [1] : vector<16x32xf32> to vector<16xf32>
    %86 = vector.shape_cast %85 : vector<16xf32> to vector<16x1xf32>
    %87 = arith.mulf %84, %84 : vector<16x32xf32>
    %cst_47 = arith.constant dense<0.000000e+00> : vector<16xf32>
    %88 = vector.multi_reduction <add>, %87, %cst_47 [1] : vector<16x32xf32> to vector<16xf32>
    %89 = vector.shape_cast %88 : vector<16xf32> to vector<16x1xf32>
    %cst_48 = arith.constant 3.125000e-02 : f32
    %90 = vector.broadcast %cst_48 : f32 to vector<16x1xf32>
    %91 = arith.mulf %86, %90 : vector<16x1xf32>
    %cst_49 = arith.constant 3.125000e-02 : f32
    %92 = vector.broadcast %cst_49 : f32 to vector<16x1xf32>
    %93 = arith.mulf %89, %92 : vector<16x1xf32>
    %94 = arith.mulf %91, %91 : vector<16x1xf32>
    %95 = arith.subf %93, %94 : vector<16x1xf32>
    %96 = vector.broadcast %91 : vector<16x1xf32> to vector<16x32xf32>
    %97 = arith.subf %84, %96 : vector<16x32xf32>
    %cst_50 = arith.constant 9.99999974E-6 : f32
    %98 = vector.broadcast %cst_50 : f32 to vector<16x1xf32>
    %99 = arith.addf %95, %98 : vector<16x1xf32>
    %100 = math.rsqrt %99 : vector<16x1xf32>
    %101 = vector.broadcast %100 : vector<16x1xf32> to vector<16x32xf32>
    %102 = arith.mulf %97, %101 : vector<16x32xf32>
    %c0_51 = arith.constant 0 : index
    %c0_52 = arith.constant 0 : index
    %c0_53 = arith.constant 0 : index
    %103 = vector.load %arg11[%c0_51, %c0_52, %c0_53] : memref<1x1x32xf32, #tpu.memory_space<vmem>>, vector<1x1x32xf32>
    %104 = vector.shape_cast %103 : vector<1x1x32xf32> to vector<1x32xf32>
    %105 = vector.broadcast %104 : vector<1x32xf32> to vector<16x32xf32>
    %106 = arith.mulf %102, %105 : vector<16x32xf32>
    %c0_54 = arith.constant 0 : index
    %c0_55 = arith.constant 0 : index
    %c0_56 = arith.constant 0 : index
    %107 = vector.load %arg12[%c0_54, %c0_55, %c0_56] : memref<1x1x32xf32, #tpu.memory_space<vmem>>, vector<1x1x32xf32>
    %108 = vector.shape_cast %107 : vector<1x1x32xf32> to vector<1x32xf32>
    %109 = vector.broadcast %108 : vector<1x32xf32> to vector<16x32xf32>
    %110 = arith.addf %106, %109 : vector<16x32xf32>
    %111 = vector.broadcast %5 : vector<16x1xf32> to vector<16x32xf32>
    %112 = arith.mulf %110, %111 : vector<16x32xf32>
    %c0_57 = arith.constant 0 : index
    %c0_58 = arith.constant 0 : index
    %c0_59 = arith.constant 0 : index
    %113 = vector.load %arg14[%c0_57, %c0_58, %c0_59] : memref<1x1x64xf32, #tpu.memory_space<vmem>>, vector<1x1x64xf32>
    %114 = vector.shape_cast %113 : vector<1x1x64xf32> to vector<1x64xf32>
    %115 = vector.shape_cast %114 : vector<1x64xf32> to vector<1x64xf32>
    %116 = vector.broadcast %115 : vector<1x64xf32> to vector<16x64xf32>
    %117 = vector.shape_cast %112 : vector<16x32xf32> to vector<2x8x32xf32>
    %118 = arith.truncf %117 : vector<2x8x32xf32> to vector<2x8x32xbf16>
    %c0_60 = arith.constant 0 : index
    %c1_61 = arith.constant 1 : index
    %c0_62 = arith.constant 0 : index
    %119 = vector.load %arg20[%c0_60, %c1_61, %c0_62] : memref<2x10x32xbf16, #tpu.memory_space<vmem>>, vector<2x8x32xbf16>
    tpu.vector_store %arg20[%c0_60, %c1_61, %c0_62], %118 {strides = array<i32>} : memref<2x10x32xbf16, #tpu.memory_space<vmem>>, vector<2x8x32xbf16>,
    %c0_63 = arith.constant 0 : index
    %c0_64 = arith.constant 0 : index
    %c0_65 = arith.constant 0 : index
    %120 = vector.load %arg20[%c0_63, %c0_64, %c0_65] : memref<2x10x32xbf16, #tpu.memory_space<vmem>>, vector<2x8x32xbf16>
    %121 = vector.shape_cast %120 : vector<2x8x32xbf16> to vector<16x32xbf16>
    %c0_66 = arith.constant 0 : index
    %c0_67 = arith.constant 0 : index
    %c0_68 = arith.constant 0 : index
    %c0_69 = arith.constant 0 : index
    %122 = vector.load %arg13[%c0_66, %c0_67, %c0_68, %c0_69] : memref<1x3x32x64xbf16, #tpu.memory_space<vmem>>, vector<1x1x32x64xbf16>
    %123 = vector.shape_cast %122 : vector<1x1x32x64xbf16> to vector<32x64xbf16>
    %cst_70 = arith.constant dense<0.000000e+00> : vector<16x64xf32>
    %124 = tpu.matmul %121, %123, %cst_70 {dimension_numbers = #tpu.dot_dimension_numbers<[1], [0], [0], [1], [0, 0, 1, 1], [], []>} : vector<16x32xbf16>, vector<32x64xbf16>, vector<16x64xf32> -> vector<16x64xf32>
    %125 = arith.addf %116, %124 : vector<16x64xf32>
    %c0_71 = arith.constant 0 : index
    %c1_72 = arith.constant 1 : index
    %c0_73 = arith.constant 0 : index
    %126 = vector.load %arg20[%c0_71, %c1_72, %c0_73] : memref<2x10x32xbf16, #tpu.memory_space<vmem>>, vector<2x8x32xbf16>
    %127 = vector.shape_cast %126 : vector<2x8x32xbf16> to vector<16x32xbf16>
    %c0_74 = arith.constant 0 : index
    %c1_75 = arith.constant 1 : index
    %c0_76 = arith.constant 0 : index
    %c0_77 = arith.constant 0 : index
    %128 = vector.load %arg13[%c0_74, %c1_75, %c0_76, %c0_77] : memref<1x3x32x64xbf16, #tpu.memory_space<vmem>>, vector<1x1x32x64xbf16>
    %129 = vector.shape_cast %128 : vector<1x1x32x64xbf16> to vector<32x64xbf16>
    %cst_78 = arith.constant dense<0.000000e+00> : vector<16x64xf32>
    %130 = tpu.matmul %127, %129, %cst_78 {dimension_numbers = #tpu.dot_dimension_numbers<[1], [0], [0], [1], [0, 0, 1, 1], [], []>} : vector<16x32xbf16>, vector<32x64xbf16>, vector<16x64xf32> -> vector<16x64xf32>
    %131 = arith.addf %125, %130 : vector<16x64xf32>
    %c0_79 = arith.constant 0 : index
    %c2 = arith.constant 2 : index
    %c0_80 = arith.constant 0 : index
    %132 = vector.load %arg20[%c0_79, %c2, %c0_80] : memref<2x10x32xbf16, #tpu.memory_space<vmem>>, vector<2x8x32xbf16>
    %133 = vector.shape_cast %132 : vector<2x8x32xbf16> to vector<16x32xbf16>
    %c0_81 = arith.constant 0 : index
    %c2_82 = arith.constant 2 : index
    %c0_83 = arith.constant 0 : index
    %c0_84 = arith.constant 0 : index
    %134 = vector.load %arg13[%c0_81, %c2_82, %c0_83, %c0_84] : memref<1x3x32x64xbf16, #tpu.memory_space<vmem>>, vector<1x1x32x64xbf16>
    %135 = vector.shape_cast %134 : vector<1x1x32x64xbf16> to vector<32x64xbf16>
    %cst_85 = arith.constant dense<0.000000e+00> : vector<16x64xf32>
    %136 = tpu.matmul %133, %135, %cst_85 {dimension_numbers = #tpu.dot_dimension_numbers<[1], [0], [0], [1], [0, 0, 1, 1], [], []>} : vector<16x32xbf16>, vector<32x64xbf16>, vector<16x64xf32> -> vector<16x64xf32>
    %137 = arith.addf %131, %136 : vector<16x64xf32>
    %cst_86 = arith.constant 0.000000e+00 : f32
    %138 = vector.broadcast %cst_86 : f32 to vector<16x64xf32>
    %139 = arith.maximumf %137, %138 : vector<16x64xf32>
    %c0_87 = arith.constant 0 : index
    %c0_88 = arith.constant 0 : index
    %c0_89 = arith.constant 0 : index
    %140 = vector.load %arg16[%c0_87, %c0_88, %c0_89] : memref<1x1x32xf32, #tpu.memory_space<vmem>>, vector<1x1x32xf32>
    %141 = vector.shape_cast %140 : vector<1x1x32xf32> to vector<1x32xf32>
    %142 = vector.shape_cast %141 : vector<1x32xf32> to vector<1x32xf32>
    %143 = vector.broadcast %142 : vector<1x32xf32> to vector<16x32xf32>
    %144 = arith.truncf %139 : vector<16x64xf32> to vector<16x64xbf16>
    %c0_90 = arith.constant 0 : index
    %c0_91 = arith.constant 0 : index
    %c0_92 = arith.constant 0 : index
    %c0_93 = arith.constant 0 : index
    %145 = vector.load %arg15[%c0_90, %c0_91, %c0_92, %c0_93] : memref<1x1x64x32xbf16, #tpu.memory_space<vmem>>, vector<1x1x64x32xbf16>
    %146 = vector.shape_cast %145 : vector<1x1x64x32xbf16> to vector<64x32xbf16>
    %cst_94 = arith.constant dense<0.000000e+00> : vector<16x32xf32>
    %147 = tpu.matmul %144, %146, %cst_94 {dimension_numbers = #tpu.dot_dimension_numbers<[1], [0], [0], [1], [0, 0, 1, 1], [], []>} : vector<16x64xbf16>, vector<64x32xbf16>, vector<16x32xf32> -> vector<16x32xf32>
    %148 = arith.addf %143, %147 : vector<16x32xf32>
    %149 = arith.addf %148, %112 : vector<16x32xf32>
    %cst_95 = arith.constant dense<0.000000e+00> : vector<16xf32>
    %150 = vector.multi_reduction <add>, %149, %cst_95 [1] : vector<16x32xf32> to vector<16xf32>
    %151 = vector.shape_cast %150 : vector<16xf32> to vector<16x1xf32>
    %152 = arith.mulf %149, %149 : vector<16x32xf32>
    %cst_96 = arith.constant dense<0.000000e+00> : vector<16xf32>
    %153 = vector.multi_reduction <add>, %152, %cst_96 [1] : vector<16x32xf32> to vector<16xf32>
    %154 = vector.shape_cast %153 : vector<16xf32> to vector<16x1xf32>
    %cst_97 = arith.constant 3.125000e-02 : f32
    %155 = vector.broadcast %cst_97 : f32 to vector<16x1xf32>
    %156 = arith.mulf %151, %155 : vector<16x1xf32>
    %cst_98 = arith.constant 3.125000e-02 : f32
    %157 = vector.broadcast %cst_98 : f32 to vector<16x1xf32>
    %158 = arith.mulf %154, %157 : vector<16x1xf32>
    %159 = arith.mulf %156, %156 : vector<16x1xf32>
    %160 = arith.subf %158, %159 : vector<16x1xf32>
    %161 = vector.broadcast %156 : vector<16x1xf32> to vector<16x32xf32>
    %162 = arith.subf %149, %161 : vector<16x32xf32>
    %cst_99 = arith.constant 9.99999974E-6 : f32
    %163 = vector.broadcast %cst_99 : f32 to vector<16x1xf32>
    %164 = arith.addf %160, %163 : vector<16x1xf32>
    %165 = math.rsqrt %164 : vector<16x1xf32>
    %166 = vector.broadcast %165 : vector<16x1xf32> to vector<16x32xf32>
    %167 = arith.mulf %162, %166 : vector<16x32xf32>
    %c0_100 = arith.constant 0 : index
    %c0_101 = arith.constant 0 : index
    %c0_102 = arith.constant 0 : index
    %168 = vector.load %arg17[%c0_100, %c0_101, %c0_102] : memref<1x1x32xf32, #tpu.memory_space<vmem>>, vector<1x1x32xf32>
    %169 = vector.shape_cast %168 : vector<1x1x32xf32> to vector<1x32xf32>
    %170 = vector.broadcast %169 : vector<1x32xf32> to vector<16x32xf32>
    %171 = arith.mulf %167, %170 : vector<16x32xf32>
    %c0_103 = arith.constant 0 : index
    %c0_104 = arith.constant 0 : index
    %c0_105 = arith.constant 0 : index
    %172 = vector.load %arg18[%c0_103, %c0_104, %c0_105] : memref<1x1x32xf32, #tpu.memory_space<vmem>>, vector<1x1x32xf32>
    %173 = vector.shape_cast %172 : vector<1x1x32xf32> to vector<1x32xf32>
    %174 = vector.broadcast %173 : vector<1x32xf32> to vector<16x32xf32>
    %175 = arith.addf %171, %174 : vector<16x32xf32>
    %176 = vector.broadcast %5 : vector<16x1xf32> to vector<16x32xf32>
    %177 = arith.mulf %175, %176 : vector<16x32xf32>
    %178 = vector.shape_cast %177 : vector<16x32xf32> to vector<2x8x32xf32>
    %c0_106 = arith.constant 0 : index
    %c0_107 = arith.constant 0 : index
    %c0_108 = arith.constant 0 : index
    %179 = vector.load %arg19[%c0_106, %c0_107, %c0_108] : memref<2x8x32xf32, #tpu.memory_space<vmem>>, vector<2x8x32xf32>
    tpu.vector_store %arg19[%c0_106, %c0_107, %c0_108], %178 {strides = array<i32>} : memref<2x8x32xf32, #tpu.memory_space<vmem>>, vector<2x8x32xf32>,
    return
  }
  func.func @transform_0(%arg0: i32) -> (i32, i32, i32) {
    %c0_i32 = arith.constant 0 : i32
    %c0_i32_0 = arith.constant 0 : i32
    %c0_i32_1 = arith.constant 0 : i32
    %c0_i32_2 = arith.constant 0 : i32
    return %c0_i32, %c0_i32_0, %c0_i32_1 : i32, i32, i32
  }
  func.func @transform_1(%arg0: i32) -> (i32, i32) {
    %c0_i32 = arith.constant 0 : i32
    %c0_i32_0 = arith.constant 0 : i32
    %c0_i32_1 = arith.constant 0 : i32
    return %c0_i32, %c0_i32_0 : i32, i32
  }
  func.func @transform_2(%arg0: i32) -> (i32, i32, i32) {
    %c0_i32 = arith.constant 0 : i32
    %c0_i32_0 = arith.constant 0 : i32
    %c0_i32_1 = arith.constant 0 : i32
    return %arg0, %c0_i32, %c0_i32_0 : i32, i32, i32
  }
  func.func @transform_3(%arg0: i32) -> (i32, i32, i32) {
    %c0_i32 = arith.constant 0 : i32
    %c0_i32_0 = arith.constant 0 : i32
    %c0_i32_1 = arith.constant 0 : i32
    return %arg0, %c0_i32, %c0_i32_0 : i32, i32, i32
  }
  func.func @transform_4(%arg0: i32) -> (i32, i32, i32) {
    %c0_i32 = arith.constant 0 : i32
    %c0_i32_0 = arith.constant 0 : i32
    %c0_i32_1 = arith.constant 0 : i32
    return %arg0, %c0_i32, %c0_i32_0 : i32, i32, i32
  }
  func.func @transform_5(%arg0: i32) -> (i32, i32, i32) {
    %c0_i32 = arith.constant 0 : i32
    %c0_i32_0 = arith.constant 0 : i32
    %c0_i32_1 = arith.constant 0 : i32
    return %arg0, %c0_i32, %c0_i32_0 : i32, i32, i32
  }
  func.func @transform_6(%arg0: i32) -> (i32, i32, i32) {
    %c0_i32 = arith.constant 0 : i32
    %c0_i32_0 = arith.constant 0 : i32
    %c0_i32_1 = arith.constant 0 : i32
    return %arg0, %c0_i32, %c0_i32_0 : i32, i32, i32
  }
  func.func @transform_7(%arg0: i32) -> (i32, i32, i32) {
    %c0_i32 = arith.constant 0 : i32
    %c0_i32_0 = arith.constant 0 : i32
    %c0_i32_1 = arith.constant 0 : i32
    return %arg0, %c0_i32, %c0_i32_0 : i32, i32, i32
  }
  func.func @transform_8(%arg0: i32) -> (i32, i32, i32, i32) {
    %c0_i32 = arith.constant 0 : i32
    %c0_i32_0 = arith.constant 0 : i32
    %c0_i32_1 = arith.constant 0 : i32
    %c0_i32_2 = arith.constant 0 : i32
    return %arg0, %c0_i32, %c0_i32_0, %c0_i32_1 : i32, i32, i32, i32
  }
  func.func @transform_9(%arg0: i32) -> (i32, i32, i32) {
    %c0_i32 = arith.constant 0 : i32
    %c0_i32_0 = arith.constant 0 : i32
    %c0_i32_1 = arith.constant 0 : i32
    return %arg0, %c0_i32, %c0_i32_0 : i32, i32, i32
  }
  func.func @transform_10(%arg0: i32) -> (i32, i32, i32) {
    %c0_i32 = arith.constant 0 : i32
    %c0_i32_0 = arith.constant 0 : i32
    %c0_i32_1 = arith.constant 0 : i32
    return %arg0, %c0_i32, %c0_i32_0 : i32, i32, i32
  }
  func.func @transform_11(%arg0: i32) -> (i32, i32, i32) {
    %c0_i32 = arith.constant 0 : i32
    %c0_i32_0 = arith.constant 0 : i32
    %c0_i32_1 = arith.constant 0 : i32
    return %arg0, %c0_i32, %c0_i32_0 : i32, i32, i32
  }
  func.func @transform_12(%arg0: i32) -> (i32, i32, i32, i32) {
    %c0_i32 = arith.constant 0 : i32
    %c0_i32_0 = arith.constant 0 : i32
    %c0_i32_1 = arith.constant 0 : i32
    %c0_i32_2 = arith.constant 0 : i32
    return %arg0, %c0_i32, %c0_i32_0, %c0_i32_1 : i32, i32, i32, i32
  }
  func.func @transform_13(%arg0: i32) -> (i32, i32, i32) {
    %c0_i32 = arith.constant 0 : i32
    %c0_i32_0 = arith.constant 0 : i32
    %c0_i32_1 = arith.constant 0 : i32
    return %arg0, %c0_i32, %c0_i32_0 : i32, i32, i32
  }
  func.func @transform_14(%arg0: i32) -> (i32, i32, i32, i32) {
    %c0_i32 = arith.constant 0 : i32
    %c0_i32_0 = arith.constant 0 : i32
    %c0_i32_1 = arith.constant 0 : i32
    %c0_i32_2 = arith.constant 0 : i32
    return %arg0, %c0_i32, %c0_i32_0, %c0_i32_1 : i32, i32, i32, i32
  }
  func.func @transform_15(%arg0: i32) -> (i32, i32, i32) {
    %c0_i32 = arith.constant 0 : i32
    %c0_i32_0 = arith.constant 0 : i32
    %c0_i32_1 = arith.constant 0 : i32
    return %arg0, %c0_i32, %c0_i32_0 : i32, i32, i32
  }
  func.func @transform_16(%arg0: i32) -> (i32, i32, i32) {
    %c0_i32 = arith.constant 0 : i32
    %c0_i32_0 = arith.constant 0 : i32
    %c0_i32_1 = arith.constant 0 : i32
    return %arg0, %c0_i32, %c0_i32_0 : i32, i32, i32
  }
  func.func @transform_17(%arg0: i32) -> (i32, i32, i32) {
    %c0_i32 = arith.constant 0 : i32
    %c0_i32_0 = arith.constant 0 : i32
    %c0_i32_1 = arith.constant 0 : i32
    return %arg0, %c0_i32, %c0_i32_0 : i32, i32, i32
  }
  func.func @transform_18(%arg0: i32) -> (i32, i32, i32) {
    %c0_i32 = arith.constant 0 : i32
    %c0_i32_0 = arith.constant 0 : i32
    %c0_i32_1 = arith.constant 0 : i32
    %c0_i32_2 = arith.constant 0 : i32
    return %c0_i32, %c0_i32_0, %c0_i32_1 : i32, i32, i32
  }
}

</mosaic_0001>

<bundles_post_ra>
// kernel: tpu_custom_call.1
= control target key start
LH: loop header
LB: loop body
LE: loop exit
PB: predicated region body
PF: predicated region fallthrough
CT: control target
= control target key end

     0   :  { %s4221_s0 = inlined_call_operand.hbm [shape: f32[2,8,32], index: 0, kind: input, shape index: {}]   ;;  %s4222_s1 = inlined_call_operand.vmem [shape: f32[16,1], index: 1, kind: input, shape index: {}]   ;;  %s4223_s2 = inlined_call_operand.vmem [shape: bf16[2,32,32], index: 2, kind: input, shape index: {}]   ;;  %s4224_s3 = inlined_call_operand.vmem [shape: f32[2,1,32], index: 3, kind: input, shape index: {}]   ;;  %s4225_s4 = inlined_call_operand.hbm [shape: bf16[2,32,32], index: 4, kind: input, shape index: {}]   ;;  %s4226_s5 = inlined_call_operand.hbm [shape: f32[2,1,32], index: 5, kind: input, shape index: {}]   ;;  %s4227_s6 = inlined_call_operand.hbm [shape: bf16[2,32,32], index: 6, kind: input, shape index: {}]   ;;  %s4228_s7 = inlined_call_operand.hbm [shape: f32[2,1,32], index: 7, kind: input, shape index: {}]   ;;  %s4229_s8 = inlined_call_operand.hbm [shape: bf16[2,2,16,32], index: 8, kind: input, shape index: {}]   ;;  %s4230_s9 = inlined_call_operand.hbm [shape: f32[2,1,32], index: 9, kind: input, shape index: {}]   ;;  %s4231_s10 = inlined_call_operand.hbm [shape: f32[2,1,32], index: 10, kind: input, shape index: {}]   ;;  %s4232_s11 = inlined_call_operand.hbm [shape: f32[2,1,32], index: 11, kind: input, shape index: {}]   ;;  %s4233_s12 = inlined_call_operand.vmem [shape: bf16[2,3,32,64], index: 12, kind: input, shape index: {}]   ;;  %s4234_s13 = inlined_call_operand.hbm [shape: f32[2,1,64], index: 13, kind: input, shape index: {}]   ;;  %s4235_s14 = inlined_call_operand.vmem [shape: bf16[2,1,64,32], index: 14, kind: input, shape index: {}]   ;;  %s4236_s15 = inlined_call_operand.vmem [shape: f32[2,1,32], index: 15, kind: input, shape index: {}]   ;;  %s4237_s16 = inlined_call_operand.vmem [shape: f32[2,1,32], index: 16, kind: input, shape index: {}]   ;;  %s4238_s17 = inlined_call_operand.vmem [shape: f32[2,1,32], index: 17, kind: input, shape index: {}]   ;;  %s4239_s18 = inlined_call_operand.hbm [shape: f32[2,8,32], index: 18, kind: output, shape index: {}]  }
   0x1   :  { %4256 = sst [smem:[#allocation31_spill]] %s4221_s0 }
   0x2   :  { %4257 = sst [smem:[#allocation32_spill]] %s4222_s1 }
   0x3   :  { %4258 = sst [smem:[#allocation33_spill]] %s4223_s2 }
   0x4   :  { %4259 = sst [smem:[#allocation34_spill]] %s4225_s4 }
   0x5   :  { %4260 = sst [smem:[#allocation35_spill]] %s4226_s5 }
   0x6   :  { %4261 = sst [smem:[#allocation36_spill]] %s4227_s6 }
   0x7   :  { %4262 = sst [smem:[#allocation37_spill]] %s4228_s7 }
   0x8   :  { %4263 = sst [smem:[#allocation38_spill]] %s4229_s8 }
   0x9   :  { %4264 = sst [smem:[#allocation39_spill]] %s4230_s9 }
   0xa   :  { %4265 = sst [smem:[#allocation40_spill]] %s4231_s10 }
   0xb   :  { %4266 = sst [smem:[#allocation41_spill]] %s4232_s11 }
   0xc   :  { %4267 = sst [smem:[#allocation42_spill]] %s4233_s12 }
   0xd   :  { %4268 = sst [smem:[#allocation43_spill]] %s4235_s14 }
   0xe   :  { %4269 = sst [smem:[#allocation44_spill]] %s4236_s15 }
   0xf   :  { %4270 = sst [smem:[#allocation45_spill]] %s4237_s16 }
  0x10   :  { %4271 = sst [smem:[#allocation46_spill]] %s4238_s17 }
  0x11   :  { %4272 = sst [smem:[#allocation47_spill]] %s4239_s18 }
  0x12   :  { %23 = vsyncpa [#allocation4], 0 }
  0x13   :  { %24 = vsyncpa [#allocation7], 0 }
  0x14   :  { %26 = vsyncpa [#allocation7 + $0x1], 0 }
  0x15   :  { %27 = vsyncpa [#allocation10], 0 }
  0x16   :  { %29 = vsyncpa [#allocation10 + $0x1], 0 }
  0x17   :  { %30 = vsyncpa [#allocation13], 0 }
  0x18   :  { %32 = vsyncpa [#allocation13 + $0x1], 0 }
  0x19   :  { %33 = vsyncpa [#allocation16], 0 }
  0x1a   :  { %35 = vsyncpa [#allocation16 + $0x1], 0 }
  0x1b   :  { %36 = vsyncpa [#allocation19], 0 }
  0x1c   :  { %38 = vsyncpa [#allocation19 + $0x1], 0 }
  0x1d   :  { %39 = vsyncpa [#allocation5], 0  ;;  %s3504_s27 = smov 0   ;;  %s3506_s28 = smov 0  }
  0x1e   :  { %s3508_s29 = smov 0   ;;  %s3510_s30 = smov 0  }
  0x1f LB: > { %4273 = sst [smem:[#allocation28_spill]] %s3381_s29  ;;  %s3525_s0 = sadd.s32 1, %s3385_s30   ;;  %s3385_s30 = sphi %s3510_s30, %s4336_s30   ;;  %s3381_s29 = sphi %s3508_s29, %s4338_s29   ;;  %s3377_s28 = sphi %s3506_s28, %s4340_s28   ;;  %s3373_s27 = sphi %s3504_s27, %s4339_s27  }
  0x20   : > { %4274 = sst [smem:[#allocation29_spill]] %s3525_s0  ;;  %s146_s19 = sadd.s32 1, %s3381_s29 }
  0x21   : > { %s143_s1 = ssub.s32 %s3385_s30, %s3525_s0  ;;  %p153_p0 = scmp.ne.s32.totalorder %s3381_s29, %s3377_s28 }
  0x22   : > { %p144_p1 = scmp.eq.s32.totalorder %s143_s1, 0  ;;  %p154_p2 = scmp.eq.s32.totalorder %s3385_s30, 0 }
  0x23   : > { %p2909_p3 = scmp.lt.s32.totalorder %s3385_s30, 2  ;;  %s3538_s21 = sand.u32 1, %s3385_s30  }
  0x24   : > { %s3535_s20 = scalar_select %p144_p1, %s3381_s29, %s146_s19  }
  0x25   : > { %p155_p4 = por %p154_p2, %p153_p0  ;;  %s3541_s22 = sand.u32 1, %s3381_s29  }
  0x26   : > { %4275 = sst [smem:[#allocation30_spill]] %s3535_s20  ;;  %s3544_s2 = sshll.u32 %s3541_s22, 4 }
  0x27   : > { %s3547_s23 = sshll.u32 %s3385_s30, 8  ;;  %s4276_s4 = sld [smem:[#allocation34_spill]] }
  0x28   : > { %s576_s19 = scalar_lea.vmem [#allocation6], %s3544_s2  ;;  %p3556_p5 = pnand %p2909_p3, %p155_p4 }
  0x29   : > { %s583_s1 = sshll.u32 %s576_s19, 4  ;;  %s3560_s1 = int_to_ptr.vmem [resolvable:$true] %s583_s1 }
  0x2a   : > { %s4277_s20 = scalar_select %p3556_p5, 1, 0 }
  0x2b   : > { %p3567_p7 = pneg %p3556_p5 }
  0x2d   : > { %s3553_s26 = scalar_lea.hbm %s4276_s4, %s3547_s23  ;;  %s3008_s18 = scalar_lea.hbm %s4276_s4, 512 }
  0x2e   : > { %s3003_s0 = scalar_lea.hbm %s3553_s26, 256  ;;  %p3009_p10 = scmp.lt.u32.totalorder %s3553_s26, %s4276_s4 }
  0x2f   : > { %p3004_p6 = scmp.ne.s32.totalorder %s3553_s26, %s3003_s0  ;;  %p3010_p11 = scmp.lt.u32.totalorder %s3008_s18, %s3003_s0 }
  0x30   : > { %s4278_s24 = scalar_select %p3567_p7, 1, 0 }
  0x31   : > { %p3006_p8 = pnand %p3567_p7, %p3004_p6  ;;  %p3011_p12 = por %p3010_p11, %p3009_p10 }
  0x32   : > { %p3012_p13 = scmp.lt.u32.totalorder %s3003_s0, %s3553_s26 }
  0x33   : > { %p3007_p9 = pneg %p3006_p8 }
  0x34   : > { %p3013_p0 = por %p3012_p13, %p3011_p12 }
  0x36   : > { %p3014_p1 = pnand %p3013_p0, %p3007_p9 }
  0x38   : > { %3017 = shalt.err (!%p3014_p1)
}
  0x39   : > { %s3018_s29 = scalar_lea.vmem %s3560_s1, 256  ;;  %s3387_s25 = smov [#allocation6]  }
  0x3a   : > { %p3019_p2 = scmp.ne.s32.totalorder %s3560_s1, %s3018_s29  ;;  %s3023_s19 = sshll.u32 %s3387_s25, 4  ;;  %s3024_s19 = int_to_ptr.vmem [resolvable:$false] %s3023_s19 }
  0x3b   : > { %s3025_s16 = scalar_lea.vmem %s3024_s19, 512  ;;  %p3026_p6 = scmp.lt.s32.totalorder %s3560_s1, %s3024_s19 }
  0x3c   : > { %p3021_p3 = pnand %p3019_p2, %p3567_p7  ;;  %p3027_p8 = scmp.lt.s32.totalorder %s3025_s16, %s3018_s29 }
  0x3e   : > { %p3022_p4 = pneg %p3021_p3  ;;  %p3028_p10 = por %p3027_p8, %p3026_p6 }
  0x40   : > { %p3029_p11 = pnand %p3028_p10, %p3022_p4 }
  0x42   : > { %3032 = shalt.err (!%p3029_p11)
}
  0x43   : > { %s3388_s17 = smov 64   ;;  %s3389_s18 = smov 4  }
  0x44   : > { %s4279_s0 = scalar_lea.sflag [#allocation7], %s3538_s21  ;;  %s4280_s6 = sld [smem:[#allocation36_spill]] }
  0x45   : > { %2883 = dma.hbm_to_vmem [thread:$0]  (!%p3556_p5), %s3553_s26, 256, %s3560_s1, %s4279_s0, %s3388_s17, %s3388_s17, %s3389_s18  }
  0x46   : > { %s614_s16 = scalar_lea.vmem [#allocation9], %s3544_s2  ;;  %s4250_s14 = scalar_lea.sflag [#allocation10], %s3538_s21 }
  0x47   : > { %s621_s4 = sshll.u32 %s614_s16, 4  ;;  %s3602_s4 = int_to_ptr.vmem [resolvable:$true] %s621_s4 }
  0x4a   : > { %s3599_s19 = scalar_lea.hbm %s4280_s6, %s3547_s23  ;;  %s3038_s0 = scalar_lea.hbm %s4280_s6, 512 }
  0x4b   : > { %s3033_s12 = scalar_lea.hbm %s3599_s19, 256  ;;  %p3039_p0 = scmp.lt.u32.totalorder %s3599_s19, %s4280_s6 }
  0x4c   : > { %p3034_p9 = scmp.ne.s32.totalorder %s3599_s19, %s3033_s12  ;;  %p3040_p1 = scmp.lt.u32.totalorder %s3038_s0, %s3033_s12 }
  0x4d   : > { %p3042_p3 = scmp.lt.u32.totalorder %s3033_s12, %s3599_s19 }
  0x4e   : > { %p3036_p12 = pnand %p3034_p9, %p3567_p7  ;;  %p3041_p2 = por %p3040_p1, %p3039_p0 }
  0x50   : > { %p3037_p13 = pneg %p3036_p12  ;;  %p3043_p4 = por %p3042_p3, %p3041_p2 }
  0x52   : > { %p3044_p6 = pnand %p3043_p4, %p3037_p13 }
  0x54   : > { %3047 = shalt.err (!%p3044_p6)
}
  0x55   : > { %s3048_s16 = scalar_lea.vmem %s3602_s4, 256  ;;  %s3390_s26 = smov [#allocation9]  }
  0x56   : > { %p3049_p8 = scmp.ne.s32.totalorder %s3602_s4, %s3048_s16  ;;  %s3053_s1 = sshll.u32 %s3390_s26, 4  ;;  %s3054_s1 = int_to_ptr.vmem [resolvable:$false] %s3053_s1 }
  0x57   : > { %s3055_s29 = scalar_lea.vmem %s3054_s1, 512  ;;  %p3056_p9 = scmp.lt.s32.totalorder %s3602_s4, %s3054_s1 }
  0x58   : > { %p3051_p10 = pnand %p3049_p8, %p3567_p7  ;;  %p3057_p12 = scmp.lt.s32.totalorder %s3055_s29, %s3048_s16 }
  0x5a   : > { %p3052_p11 = pneg %p3051_p10  ;;  %p3058_p0 = por %p3057_p12, %p3056_p9 }
  0x5c   : > { %p3059_p1 = pnand %p3058_p0, %p3052_p11 }
  0x5e   : > { %3062 = shalt.err (!%p3059_p1)
}
  0x5f   : > { %2889 = dma.hbm_to_vmem [thread:$0]  (!%p3556_p5), %s3599_s19, 256, %s3602_s4, %s4250_s14, %s3388_s17, %s3388_s17, %s3389_s18  }
  0x60   : > { %s4281_s8 = sld [smem:[#allocation38_spill]]  ;;  %s652_s16 = scalar_lea.vmem [#allocation12], %s3544_s2 }
  0x61   : > { %s659_s26 = sshll.u32 %s652_s16, 4  ;;  %s3639_s1 = sshll.u32 %s3385_s30, 4  ;;  %s3641_s26 = int_to_ptr.vmem [resolvable:$true] %s659_s26 }
  0x62   : > { %s4249_s29 = scalar_lea.sflag [#allocation13], %s3538_s21 }
  0x66   : > { %s3635_s25 = scalar_lea.hbm %s4281_s8, %s3547_s23  ;;  %s3068_s23 = scalar_lea.hbm %s4281_s8, 512 }
  0x67   : > { %s3063_s6 = scalar_lea.hbm %s3635_s25, 256  ;;  %p3069_p4 = scmp.lt.u32.totalorder %s3635_s25, %s4281_s8 }
  0x68   : > { %p3064_p13 = scmp.ne.s32.totalorder %s3635_s25, %s3063_s6  ;;  %p3070_p6 = scmp.lt.u32.totalorder %s3068_s23, %s3063_s6 }
  0x69   : > { %p3072_p10 = scmp.lt.u32.totalorder %s3063_s6, %s3635_s25 }
  0x6a   : > { %p3066_p2 = pnand %p3064_p13, %p3567_p7  ;;  %p3071_p8 = por %p3070_p6, %p3069_p4 }
  0x6c   : > { %p3067_p3 = pneg %p3066_p2  ;;  %p3073_p11 = por %p3072_p10, %p3071_p8 }
  0x6e   : > { %p3074_p9 = pnand %p3073_p11, %p3067_p3 }
  0x70   : > { %3077 = shalt.err (!%p3074_p9)
}
  0x71   : > { %s3078_s2 = scalar_lea.vmem %s3641_s26, 256  ;;  %s3391_s16 = smov [#allocation12]  }
  0x72   : > { %p3079_p12 = scmp.ne.s32.totalorder %s3641_s26, %s3078_s2  ;;  %s3083_s4 = sshll.u32 %s3391_s16, 4  ;;  %s3084_s4 = int_to_ptr.vmem [resolvable:$false] %s3083_s4 }
  0x73   : > { %s3085_s19 = scalar_lea.vmem %s3084_s4, 512  ;;  %p3086_p13 = scmp.lt.s32.totalorder %s3641_s26, %s3084_s4 }
  0x74   : > { %p3081_p0 = pnand %p3079_p12, %p3567_p7  ;;  %p3087_p2 = scmp.lt.s32.totalorder %s3085_s19, %s3078_s2 }
  0x76   : > { %p3082_p1 = pneg %p3081_p0  ;;  %p3088_p4 = por %p3087_p2, %p3086_p13 }
  0x78   : > { %p3089_p6 = pnand %p3088_p4, %p3082_p1 }
  0x7a   : > { %3092 = shalt.err (!%p3089_p6)
}
  0x7b   : > { %2895 = dma.hbm_to_vmem [thread:$0]  (!%p3556_p5), %s3635_s25, 256, %s3641_s26, %s4249_s29, %s3388_s17, %s3388_s17, %s3389_s18  }
  0x7c   : > { %s4282_s10 = sld [smem:[#allocation40_spill]]  ;;  %s689_s0 = scalar_lea.vmem [#allocation15], %s3541_s22 }
  0x7d   : > { %s696_s2 = sshll.u32 %s689_s0, 4  ;;  %s4248_s16 = scalar_lea.sflag [#allocation16], %s3538_s21  ;;  %s697_s2 = int_to_ptr.vmem [resolvable:$true] %s696_s2 }
  0x82   : > { %s3674_s12 = scalar_lea.hbm %s4282_s10, %s3639_s1  ;;  %s3098_s18 = scalar_lea.hbm %s4282_s10, 32 }
  0x83   : > { %s3093_s4 = scalar_lea.hbm %s3674_s12, 16  ;;  %p3099_p11 = scmp.lt.u32.totalorder %s3674_s12, %s4282_s10 }
  0x84   : > { %p3094_p3 = scmp.ne.s32.totalorder %s3674_s12, %s3093_s4  ;;  %p3100_p9 = scmp.lt.u32.totalorder %s3098_s18, %s3093_s4 }
  0x85   : > { %p3102_p0 = scmp.lt.u32.totalorder %s3093_s4, %s3674_s12 }
  0x86   : > { %p3096_p8 = pnand %p3094_p3, %p3567_p7  ;;  %p3101_p12 = por %p3100_p9, %p3099_p11 }
  0x88   : > { %p3097_p10 = pneg %p3096_p8  ;;  %p3103_p1 = por %p3102_p0, %p3101_p12 }
  0x8a   : > { %p3104_p13 = pnand %p3103_p1, %p3097_p10 }
  0x8c   : > { %3107 = shalt.err (!%p3104_p13)
}
  0x8d   : > { %s3108_s6 = scalar_lea.vmem %s697_s2, 16  ;;  %s3392_s23 = smov [#allocation15]  }
  0x8e   : > { %p3109_p2 = scmp.ne.s32.totalorder %s697_s2, %s3108_s6  ;;  %s3113_s0 = sshll.u32 %s3392_s23, 4  ;;  %s3114_s0 = int_to_ptr.vmem [resolvable:$false] %s3113_s0 }
  0x8f   : > { %s3115_s19 = scalar_lea.vmem %s3114_s0, 32  ;;  %p3116_p3 = scmp.lt.s32.totalorder %s697_s2, %s3114_s0 }
  0x90   : > { %p3111_p4 = pnand %p3109_p2, %p3567_p7  ;;  %p3117_p8 = scmp.lt.s32.totalorder %s3115_s19, %s3108_s6 }
  0x92   : > { %p3112_p6 = pneg %p3111_p4  ;;  %p3118_p5 = por %p3117_p8, %p3116_p3 }
  0x94   : > { %p3119_p9 = pnand %p3118_p5, %p3112_p6 }
  0x96   : > { %3122 = shalt.err (!%p3119_p9)
}
  0x97   : > { %p4283_p11 = scmp.ne.s32.totalorder %s4277_s20, 0  ;;  %s3698_s4 = sadd.s32 4294967295, %s3385_s30  }
  0x98   : > { %p159_p5 = scmp.ne.s32.totalorder %s3377_s28, %s3373_s27  ;;  %p4251_p10 = scmp.eq.s32.totalorder %s3698_s4, 0 }
  0x99   : > { %2901 = dma.hbm_to_vmem [thread:$0]  (!%p4283_p11), %s3674_s12, 16, %s697_s2, %s4248_s16  }
  0x9a   : > { %p2574_p12 = scmp.ge.s32.totalorder %s3385_s30, 1  ;;  %p529_p0 = scmp.lt.s32.totalorder %s3385_s30, 3 }
  0x9b   : > { %p3708_p13 = por %p4251_p10, %p159_p5  ;;  %s3393_s12 = smov [#allocation3]  }
  0x9c   : > { %p3712_p2 = pnand %p2574_p12, %p529_p0  ;;  %s541_s2 = sshll.u32 %s3393_s12, 4  ;;  %s3716_s2 = int_to_ptr.vmem [resolvable:$true] %s541_s2 }
  0x9d   : > { %s4284_s17 = scalar_select %p3708_p13, 1, 0 }
  0x9e   : > { %s4285_s18 = scalar_select %p3712_p2, 1, 0 }
  0x9f   : > { %p2876_p4 = pneg %p3712_p2  ;;  %s4286_s5 = sld [smem:[#allocation35_spill]] }
  0xa0   : > { %s596_s6 = scalar_lea.vmem [#allocation8], %s3541_s22  ;;  %s4288_s7 = sld [smem:[#allocation37_spill]] }
  0xa1   : > { %p3728_p6 = pnand %p2876_p4, %p4251_p10  ;;  %s603_s23 = sshll.u32 %s596_s6, 4  ;;  %s3733_s23 = int_to_ptr.vmem [resolvable:$true] %s603_s23 }
  0xa2   : > { %s4289_s27 = sld [smem:[#allocation31_spill]] }
  0xa3   : > { %p3125_p8 = pneg %p3728_p6 }
  0xa5   : > { %s3724_s30 = scalar_lea.hbm %s4286_s5, %s3639_s1 }
  0xa6   : > { %s3739_s12 = scalar_lea.hbm %s4288_s7, %s3639_s1 }
  0xa8   : > { %s4290_s25 = smov %s4289_s27  ;;  %s3123_s14 = scalar_lea.hbm %s4289_s27, 256 }
  0xa9   : > { %p3124_p3 = scmp.ne.s32.totalorder %s4290_s25, %s3123_s14  ;;  %p3130_p12 = scmp.lt.u32.totalorder %s3123_s14, %s4290_s25 }
  0xab   : > { %p3126_p9 = pnand %p3125_p8, %p3124_p3 }
  0xad   : > { %p3127_p5 = pneg %p3126_p9 }
  0xaf   : > { %p3132_p0 = pnand %p3130_p12, %p3127_p5 }
  0xb1   : > { %3135 = shalt.err (!%p3132_p0)
}
  0xb2   : > { %s3136_s0 = scalar_lea.vmem %s3716_s2, 256  ;;  %p3144_p13 = scmp.lt.s32.totalorder %s3716_s2, %s3716_s2 }
  0xb3   : > { %p3137_p4 = scmp.ne.s32.totalorder %s3716_s2, %s3136_s0  ;;  %p3145_p2 = scmp.lt.s32.totalorder %s3136_s0, %s3136_s0 }
  0xb5   : > { %p3139_p1 = pnand %p3137_p4, %p3125_p8  ;;  %p3146_p11 = por %p3145_p2, %p3144_p13 }
  0xb7   : > { %p3140_p10 = pneg %p3139_p1 }
  0xb9   : > { %p3147_p7 = pnand %p3146_p11, %p3140_p10 }
  0xbb   : > { %3150 = shalt.err (!%p3147_p7)
}
  0xbc   : > { %s3394_s8 = smov 128   ;;  %s3395_s10 = smov 8  }
  0xbd   : > { %2879 = dma.hbm_to_vmem [thread:$0]  (!%p3728_p6), %s4290_s25, 256, %s3716_s2, [#allocation4], %s3394_s8, %s3394_s8, %s3395_s10  }
  0xbe   : > { %s3151_s29 = scalar_lea.hbm %s3724_s30, 16  ;;  %p4291_p3 = scmp.ne.s32.totalorder %s4278_s24, 0 }
  0xbf   : > { %p3152_p1 = scmp.ne.s32.totalorder %s3724_s30, %s3151_s29  ;;  %s3156_s27 = scalar_lea.hbm %s4286_s5, 32 }
  0xc0   : > { %p3157_p7 = scmp.lt.u32.totalorder %s3724_s30, %s4286_s5  ;;  %p3158_p10 = scmp.lt.u32.totalorder %s3156_s27, %s3151_s29 }
  0xc1   : > { %p3154_p13 = pnand %p3152_p1, %p4291_p3  ;;  %p3160_p8 = scmp.lt.u32.totalorder %s3151_s29, %s3724_s30 }
  0xc2   : > { %p3159_p2 = por %p3158_p10, %p3157_p7 }
  0xc3   : > { %p3155_p11 = pneg %p3154_p13 }
  0xc4   : > { %p3161_p9 = por %p3160_p8, %p3159_p2 }
  0xc6   : > { %p3162_p5 = pnand %p3161_p9, %p3155_p11 }
  0xc8   : > { %3165 = shalt.err (!%p3162_p5)
}
  0xc9   : > { %s3166_s2 = scalar_lea.vmem %s3733_s23, 16  ;;  %s3396_s26 = smov [#allocation8]  }
  0xca   : > { %p3167_p6 = scmp.ne.s32.totalorder %s3733_s23, %s3166_s2  ;;  %s3171_s8 = sshll.u32 %s3396_s26, 4  ;;  %s3172_s8 = int_to_ptr.vmem [resolvable:$false] %s3171_s8 }
  0xcb   : > { %s3173_s10 = scalar_lea.vmem %s3172_s8, 32  ;;  %p3174_p4 = scmp.lt.s32.totalorder %s3733_s23, %s3172_s8 }
  0xcc   : > { %p3169_p12 = pnand %p3167_p6, %p4291_p3  ;;  %p3175_p1 = scmp.lt.s32.totalorder %s3173_s10, %s3166_s2 }
  0xce   : > { %p3170_p0 = pneg %p3169_p12  ;;  %p3176_p13 = por %p3175_p1, %p3174_p4 }
  0xd0   : > { %p3177_p7 = pnand %p3176_p13, %p3170_p0 }
  0xd2   : > { %3180 = shalt.err (!%p3177_p7)
}
  0xd3   : > { %p4292_p11 = scmp.ne.s32.totalorder %s4277_s20, 0  ;;  %s4293_s14 = scalar_lea.sflag [#allocation7], %s3538_s21 }
  0xd4   : > { %s634_s15 = scalar_lea.vmem [#allocation11], %s3541_s22  ;;  %s4294_s9 = sld [smem:[#allocation39_spill]] }
  0xd5   : > { %2886 = dma.hbm_to_vmem [thread:$0]  (!%p4292_p11), %s3724_s30, 16, %s3733_s23, %s4293_s14  }
  0xd6   : > { %s641_s29 = sshll.u32 %s634_s15, 4  ;;  %s3181_s6 = scalar_lea.hbm %s3739_s12, 16  ;;  %s642_s29 = int_to_ptr.vmem [resolvable:$true] %s641_s29 }
  0xd7   : > { %p3182_p10 = scmp.ne.s32.totalorder %s3739_s12, %s3181_s6  ;;  %s3186_s26 = scalar_lea.hbm %s4288_s7, 32 }
  0xd8   : > { %p3187_p9 = scmp.lt.u32.totalorder %s3739_s12, %s4288_s7  ;;  %p3188_p5 = scmp.lt.u32.totalorder %s3186_s26, %s3181_s6 }
  0xd9   : > { %p3184_p2 = pnand %p3182_p10, %p4291_p3  ;;  %p3190_p12 = scmp.lt.u32.totalorder %s3181_s6, %s3739_s12 }
  0xda   : > { %s3790_s27 = scalar_lea.hbm %s4294_s9, %s3639_s1  ;;  %p3189_p6 = por %p3188_p5, %p3187_p9 }
  0xdb   : > { %p3185_p8 = pneg %p3184_p2 }
  0xdc   : > { %p3191_p0 = por %p3190_p12, %p3189_p6 }
  0xde   : > { %p3192_p4 = pnand %p3191_p0, %p3185_p8 }
  0xe0   : > { %3195 = shalt.err (!%p3192_p4)
}
  0xe1   : > { %s3196_s30 = scalar_lea.vmem %s642_s29, 16  ;;  %s3397_s23 = smov [#allocation11]  }
  0xe2   : > { %p3197_p1 = scmp.ne.s32.totalorder %s642_s29, %s3196_s30  ;;  %s3201_s14 = sshll.u32 %s3397_s23, 4  ;;  %s3202_s14 = int_to_ptr.vmem [resolvable:$false] %s3201_s14 }
  0xe3   : > { %s3203_s15 = scalar_lea.vmem %s3202_s14, 32  ;;  %p3204_p10 = scmp.lt.s32.totalorder %s642_s29, %s3202_s14 }
  0xe4   : > { %p3199_p13 = pnand %p3197_p1, %p4291_p3  ;;  %p3205_p2 = scmp.lt.s32.totalorder %s3203_s15, %s3196_s30 }
  0xe6   : > { %p3200_p7 = pneg %p3199_p13  ;;  %p3206_p11 = por %p3205_p2, %p3204_p10 }
  0xe8   : > { %p3207_p5 = pnand %p3206_p11, %p3200_p7 }
  0xea   : > { %3210 = shalt.err (!%p3207_p5)
}
  0xeb   : > { %p4295_p9 = scmp.ne.s32.totalorder %s4277_s20, 0  ;;  %s4296_s16 = scalar_lea.sflag [#allocation10], %s3538_s21 }
  0xec   : > { %s672_s19 = scalar_lea.vmem [#allocation14], %s3541_s22  ;;  %s4297_s11 = sld [smem:[#allocation41_spill]] }
  0xed   : > { %2892 = dma.hbm_to_vmem [thread:$0]  (!%p4295_p9), %s3739_s12, 16, %s642_s29, %s4296_s16  }
  0xee   : > { %s679_s6 = sshll.u32 %s672_s19, 4  ;;  %s3211_s8 = scalar_lea.hbm %s3790_s27, 16  ;;  %s680_s6 = int_to_ptr.vmem [resolvable:$true] %s679_s6 }
  0xef   : > { %p3212_p11 = scmp.ne.s32.totalorder %s3790_s27, %s3211_s8  ;;  %s3216_s23 = scalar_lea.hbm %s4294_s9, 32 }
  0xf0   : > { %p3217_p12 = scmp.lt.u32.totalorder %s3790_s27, %s4294_s9  ;;  %p3218_p0 = scmp.lt.u32.totalorder %s3216_s23, %s3211_s8 }
  0xf1   : > { %p3214_p8 = pnand %p3212_p11, %p4291_p3  ;;  %p3220_p1 = scmp.lt.u32.totalorder %s3211_s8, %s3790_s27 }
  0xf2   : > { %s3816_s26 = scalar_lea.hbm %s4297_s11, %s3639_s1  ;;  %p3219_p4 = por %p3218_p0, %p3217_p12 }
  0xf3   : > { %p3215_p6 = pneg %p3214_p8 }
  0xf4   : > { %p3221_p13 = por %p3220_p1, %p3219_p4 }
  0xf6   : > { %p3222_p7 = pnand %p3221_p13, %p3215_p6 }
  0xf8   : > { %3225 = shalt.err (!%p3222_p7)
}
  0xf9   : > { %s3226_s12 = scalar_lea.vmem %s680_s6, 16  ;;  %s3398_s29 = smov [#allocation14]  }
  0xfa   : > { %p3227_p10 = scmp.ne.s32.totalorder %s680_s6, %s3226_s12  ;;  %s3231_s16 = sshll.u32 %s3398_s29, 4  ;;  %s3232_s16 = int_to_ptr.vmem [resolvable:$false] %s3231_s16 }
  0xfb   : > { %s3233_s19 = scalar_lea.vmem %s3232_s16, 32  ;;  %p3234_p11 = scmp.lt.s32.totalorder %s680_s6, %s3232_s16 }
  0xfc   : > { %p3229_p2 = pnand %p3227_p10, %p4291_p3  ;;  %p3235_p8 = scmp.lt.s32.totalorder %s3233_s19, %s3226_s12 }
  0xfe   : > { %p3230_p5 = pneg %p3229_p2  ;;  %p3236_p9 = por %p3235_p8, %p3234_p11 }
 0x100   : > { %p3237_p0 = pnand %p3236_p9, %p3230_p5 }
 0x102   : > { %3240 = shalt.err (!%p3237_p0)
}
 0x103   : > { %p4298_p12 = scmp.ne.s32.totalorder %s4277_s20, 0  ;;  %s4299_s0 = scalar_lea.sflag [#allocation13], %s3538_s21 }
 0x104   : > { %s706_s2 = scalar_lea.vmem [#allocation17], %s3541_s22  ;;  %s3241_s10 = scalar_lea.hbm %s3816_s26, 16 }
 0x105   : > { %2898 = dma.hbm_to_vmem [thread:$0]  (!%p4298_p12), %s3790_s27, 16, %s680_s6, %s4299_s0  }
 0x106   : > { %s713_s8 = sshll.u32 %s706_s2, 4  ;;  %p3242_p6 = scmp.ne.s32.totalorder %s3816_s26, %s3241_s10  ;;  %s714_s8 = int_to_ptr.vmem [resolvable:$true] %s713_s8 }
 0x107   : > { %s3246_s14 = scalar_lea.hbm %s4297_s11, 32  ;;  %p3247_p1 = scmp.lt.u32.totalorder %s3816_s26, %s4297_s11 }
 0x108   : > { %p3244_p9 = pnand %p3242_p6, %p4291_p3  ;;  %p3248_p13 = scmp.lt.u32.totalorder %s3246_s14, %s3241_s10 }
 0x109   : > { %p3250_p10 = scmp.lt.u32.totalorder %s3241_s10, %s3816_s26 }
 0x10a   : > { %p3245_p4 = pneg %p3244_p9  ;;  %p3249_p7 = por %p3248_p13, %p3247_p1 }
 0x10c   : > { %p3251_p2 = por %p3250_p10, %p3249_p7 }
 0x10e   : > { %p3252_p5 = pnand %p3251_p2, %p3245_p4 }
 0x110   : > { %3255 = shalt.err (!%p3252_p5)
}
 0x111   : > { %s3256_s27 = scalar_lea.vmem %s714_s8, 16  ;;  %s3399_s6 = smov [#allocation17]  }
 0x112   : > { %p3257_p11 = scmp.ne.s32.totalorder %s714_s8, %s3256_s27  ;;  %s3261_s29 = sshll.u32 %s3399_s6, 4  ;;  %s3262_s29 = int_to_ptr.vmem [resolvable:$false] %s3261_s29 }
 0x113   : > { %s3263_s16 = scalar_lea.vmem %s3262_s29, 32  ;;  %p3264_p6 = scmp.lt.s32.totalorder %s714_s8, %s3262_s29 }
 0x114   : > { %p3259_p8 = pnand %p3257_p11, %p4291_p3  ;;  %p3265_p9 = scmp.lt.s32.totalorder %s3263_s16, %s3256_s27 }
 0x116   : > { %p3260_p0 = pneg %p3259_p8  ;;  %p3266_p12 = por %p3265_p9, %p3264_p6 }
 0x118   : > { %p3267_p1 = pnand %p3266_p12, %p3260_p0 }
 0x11a   : > { %3270 = shalt.err (!%p3267_p1)
}
 0x11b   : > { %p4300_p13 = scmp.ne.s32.totalorder %s4277_s20, 0  ;;  %s4301_s19 = scalar_lea.sflag [#allocation16], %s3538_s21 }
 0x11c   : > { %s3861_s10 = scalar_lea.hbm %s4234_s13, %s3639_s1  ;;  %s731_s30 = scalar_lea.vmem [#allocation18], %s3541_s22 }
 0x11d   : > { %2904 = dma.hbm_to_vmem [thread:$0]  (!%p4300_p13), %s3816_s26, 16, %s714_s8, %s4301_s19  }
 0x11e   : > { %s738_s23 = sshll.u32 %s731_s30, 4  ;;  %s729_s14 = scalar_lea.sflag [#allocation19], %s3541_s22  ;;  %s739_s23 = int_to_ptr.vmem [resolvable:$true] %s738_s23 }
 0x11f   : > { %s3271_s21 = scalar_lea.hbm %s3861_s10, 16  ;;  %s3276_s8 = scalar_lea.hbm %s4234_s13, 32 }
 0x120   : > { %p3272_p12 = scmp.ne.s32.totalorder %s3861_s10, %s3271_s21  ;;  %p3277_p10 = scmp.lt.u32.totalorder %s3861_s10, %s4234_s13 }
 0x121   : > { %p3278_p2 = scmp.lt.u32.totalorder %s3276_s8, %s3271_s21  ;;  %p3280_p11 = scmp.lt.u32.totalorder %s3271_s21, %s3861_s10 }
 0x122   : > { %p3274_p4 = pnand %p3272_p12, %p4291_p3 }
 0x123   : > { %p3279_p5 = por %p3278_p2, %p3277_p10 }
 0x124   : > { %p3275_p7 = pneg %p3274_p4 }
 0x125   : > { %p3281_p8 = por %p3280_p11, %p3279_p5 }
 0x127   : > { %p3282_p0 = pnand %p3281_p8, %p3275_p7 }
 0x129   : > { %3285 = shalt.err (!%p3282_p0)
}
 0x12a   : > { %s3286_s22 = scalar_lea.vmem %s739_s23, 16  ;;  %s3400_s27 = smov [#allocation18]  }
 0x12b   : > { %p3287_p6 = scmp.ne.s32.totalorder %s739_s23, %s3286_s22  ;;  %s3291_s6 = sshll.u32 %s3400_s27, 4  ;;  %s3292_s6 = int_to_ptr.vmem [resolvable:$false] %s3291_s6 }
 0x12c   : > { %s3293_s29 = scalar_lea.vmem %s3292_s6, 32  ;;  %p3294_p12 = scmp.lt.s32.totalorder %s739_s23, %s3292_s6 }
 0x12d   : > { %p3289_p9 = pnand %p3287_p6, %p4291_p3  ;;  %p3295_p4 = scmp.lt.s32.totalorder %s3293_s29, %s3286_s22 }
 0x12f   : > { %p3290_p1 = pneg %p3289_p9  ;;  %p3296_p13 = por %p3295_p4, %p3294_p12 }
 0x131   : > { %p3297_p2 = pnand %p3296_p13, %p3290_p1 }
 0x133   : > { %3300 = shalt.err (!%p3297_p2)
}
 0x134   : > { %p4302_p10 = scmp.ne.s32.totalorder %s4277_s20, 0  ;;  %p4303_p7 = scmp.ne.s32.totalorder %s4285_s18, 0 }
 0x135   : > { %p4304_p5 = scmp.eq.s32.totalorder (!%p4303_p7), %s3698_s4, 0 }
 0x136   : > { %2907 = dma.hbm_to_vmem [thread:$0]  (!%p4302_p10), %s3861_s10, 16, %s739_s23, %s729_s14  }
 0x137   : > { %773 = sbr.rel (%p4303_p7) target bundleno = 3141 (0xc45), region = 92 }
 0x13e   : > { %3344 = dma.done.wait (%p4304_p5), [#allocation4], 256   ;;  %p4305_p3 = pmov %p4304_p5 }
 0x13f   : > { %s779_s24 = sand.u32 1, %s3698_s4   ;;  %s3890_s16 = sand.u32 1, %s3377_s28  }
 0x140   : > { %3346 = vsyncadd (%p4305_p3), [#allocation4], 4294967040  ;;  %s3893_s19 = sshll.u32 %s3890_s16, 4  ;;  %s780_s20 = scalar_lea.sflag [#allocation7], %s779_s24 }
 0x141   : > { %p4306_p13 = scmp.ne.s32.totalorder %s4284_s17, 0 }
 0x143   : > { %3348 = dma.done.wait (%p4306_p13), %s780_s20, 272  }
 0x144   : > { %3350 = vsyncadd (%p4306_p13), %s780_s20, 4294967024  ;;  %s797_s2 = scalar_lea.sflag [#allocation10], %s779_s24 }
 0x145   : > { %3352 = dma.done.wait (%p4306_p13), %s797_s2, 272  }
 0x146   : > { %3354 = vsyncadd (%p4306_p13), %s797_s2, 4294967024  ;;  %s814_s23 = scalar_lea.sflag [#allocation13], %s779_s24 }
 0x147   : > { %3356 = dma.done.wait (%p4306_p13), %s814_s23, 272  }
 0x148   : > { %3358 = vsyncadd (%p4306_p13), %s814_s23, 4294967024  ;;  %s831_s15 = scalar_lea.sflag [#allocation16], %s779_s24 }
 0x149   : > { %3360 = dma.done.wait (%p4306_p13), %s831_s15, 32  }
 0x14a   : > { %3362 = vsyncadd (%p4306_p13), %s831_s15, 4294967264  ;;  %s847_s12 = scalar_lea.sflag [#allocation19], %s3890_s16 }
 0x14b   : > { %3364 = dma.done.wait (%p4306_p13), %s847_s12, 16  }
 0x14c   : > { %3366 = vsyncadd (%p4306_p13), %s847_s12, 4294967280  ;;  %p958_p11 = scmp.lt.s32.totalorder %s3698_s4, 1  ;;  %s4307_s2 = sld [smem:[#allocation33_spill]] }
 0x14d   : > { %s4308_s26 = sld [smem:[#allocation44_spill]]  ;;  %s4309_s18 = sld [smem:[#allocation42_spill]] }
 0x14e   : > { %s3927_s22 = scalar_select %p958_p11, %s3698_s4, 1 }
 0x14f   : > { %s4310_s6 = sld [smem:[#allocation43_spill]]  ;;  %s4312_s9 = sld [smem:[#allocation46_spill]] }
 0x150   : > { %s2672_s27 = sshll.u32 %s3927_s22, 4  ;;  %s2849_s15 = smul.u32 48, %s3927_s22 }
 0x151   : > { %s2673_s12 = sshll.u32 %s3927_s22, 5  ;;  %p4313_p8 = scmp.ne.s32.totalorder %s3698_s4, 0 }
 0x152   : > { %s3937_s23 = scalar_lea.vmem %s4307_s2, %s2672_s27  ;;  %s4311_s27 = sld [smem:[#allocation45_spill]]  ;;  %v990_v0 = vld [vmem:[#allocation3] sm:$0xff] (!%p4313_p8)  ;;  %vm992_vm0 = vcmask (!%p4313_p8), 261120   ;;  %v991_v1 = vld [vmem:[#allocation3 + $0x8] sm:$0xff] (!%p4313_p8)  ;;  %vm995_vm1 = vcmask (!%p4313_p8), 257024   ;;  %vm997_vm2 = vcmask (!%p4313_p8), 253952  }
 0x153   : > { %s978_s21 = scalar_lea.vmem %s4308_s26, %s3927_s22  ;;  %s3948_s10 = scalar_lea.vmem %s4309_s18, %s2849_s15  ;;  %993 = vst.msk [vmem:[#allocation20] sm:$0xff] (!%p4313_p8), %vm992_vm0, %v990_v0  ;;  %994 = vst.msk [vmem:[#allocation20 + $0x8] sm:$0xff] (!%p4313_p8), %vm992_vm0, %v991_v1  ;;  %v3401_v2 = vmov (!%p4313_p8), 0  }
 0x154   : > { %989 = sbr.rel (%p4313_p8) target bundleno = 347 (0x15b), region = 136  ;;  %996 = vst.msk [vmem:[#allocation2] sm:$0xf] (!%p4313_p8), %vm995_vm1, %v3401_v2  ;;  %999 = vst.msk [vmem:[#allocation2 + $0x8] sm:$0xf] (!%p4313_p8), %vm995_vm1, %v3401_v2 }
 0x155   : > { %s3953_s29 = scalar_lea.vmem %s4310_s6, %s2673_s12  ;;  %s984_s11 = scalar_lea.vmem %s4312_s9, %s3927_s22  ;;  %998 = vst.msk [vmem:[#allocation2 + $0x4] sm:$0x1] (!%p4313_p8), %vm997_vm2, %v3401_v2  ;;  %1000 = vst.msk [vmem:[#allocation2 + $0xc] sm:$0x1] (!%p4313_p8), %vm997_vm2, %v3401_v2 }
 0x158   : > { %s981_s17 = scalar_lea.vmem %s4311_s27, %s3927_s22 }
 0x15b PF: > { %s4314_s5 = scalar_lea.vmem [#allocation6], %s3893_s19  ;;  %v3402_v4 = vmov 0.0   ;;  %v2961_v5 = vld [vmem:[%s3937_s23] sm:$0xff]   ;;  %vm3403_vm3 = vmmov 0   ;;  %v3975_v7 = vld [vmem:[#allocation20] sm:$0xff]  ;;  %v3977_v8 = vld [vmem:[#allocation20 + $0x8] sm:$0xff]  ;;  %s4319_s26 = scalar_lea.vmem %s4224_s3, %s3927_s22 }
 0x15c   : > { %v2960_v3 = vld [vmem:[%s4314_s5] sm:$0xff]   ;;  %2727 = vmatprep.subr.bf16.mxu1 %v3402_v4  ;;  %2719 = vmatprep.subr.bf16.mxu0 %v3402_v4  ;;  %s4315_s7 = smov %s4314_s5  ;;  %v2963_v9 = vld [vmem:[%s3937_s23 + $0x8] sm:$0xff]   ;;  %v1005_v10 = vpack.c.bf16 %v3977_v8, %v3975_v7  ;;  %vm1029_vm4 = vcmask 261120   ;;  %s4316_s9 = scalar_lea.vmem [#allocation9], %s3893_s19  ;;  %vm1217_vm5 = vcmask 130048   ;;  %vm1338_vm6 = vcmask 1043456  }
 0x15d   : > { %2728 = vmatpush3.bf16.msra.mxu1 %v2960_v3  ;;  %v2962_v6 = vld [vmem:[%s4315_s7 + $0x8] sm:$0xff]   ;;  %2731 = vmatprep.mubr.msk.bf16.mxu1 %vm3403_vm3, %v3402_v4  ;;  %s4317_s0 = smov %s4316_s9  ;;  %s4318_s18 = scalar_lea.vmem [#allocation8], %s3890_s16  ;;  %v2603_v14 = vld [vmem:[%s4319_s26] ss:$0 sm:$0xff]  ;;  %vm1310_vm7 = vcmask 64512   ;;  %vm1862_vm8 = vcmask 257024  }
 0x15e   : > { %2729 = vmatprep.subr.bf16.mxu1 %v3402_v4  ;;  %2720 = vmatpush3.bf16.msra.mxu0 %v2961_v5  ;;  %v2964_v11 = vld [vmem:[%s4316_s9] sm:$0xff]   ;;  %v2607_v13 = vld [vmem:[%s4318_s18] ss:$0 sm:$0xff]  ;;  %s4320_s8 = scalar_lea.vmem [#allocation11], %s3890_s16  ;;  %s3404_s1 = smov 112   ;;  %vm1868_vm10 = vcmask 253952  }
 0x15f   : > { %2721 = vmatprep.subr.bf16.mxu0 %v3402_v4  ;;  %2723 = vmatprep.mubr.msk.bf16.mxu0 %vm3403_vm3, %v3402_v4  ;;  %v2965_v12 = vld [vmem:[%s4317_s0 + $0x8] sm:$0xff]   ;;  %v2611_v32 = vld [vmem:[%s4320_s8] ss:$0 sm:$0xff]  ;;  %s4321_s24 = scalar_lea.vmem [#allocation12], %s3893_s19  ;;  %s4323_s19 = scalar_lea.vmem [#allocation14], %s3890_s16  ;;  %vm2056_vm1 = vcmask 1042432  }
 0x160   : > { %s4322_s23 = smov %s4321_s24  ;;  %s4324_s6 = sld [smem:[#allocation32_spill]]  ;;  %vm1863_vm9 = vsmask.f32 7938  ;;  %vm1869_vm11 = vsmask.f32 256  ;;  %vm2057_vm2 = vcmask 1046532  }
 0x161   : > { %2730 = vmatpush3.bf16.msra.mxu1 %v2962_v6  ;;  %s4325_s2 = scalar_lea.vmem [#allocation15], %s3890_s16  ;;  %s4326_s5 = scalar_lea.vmem [#allocation17], %s3890_s16  ;;  %vm4125_vm12 = vmand %vm1862_vm8, %vm1863_vm9  ;;  %vm1953_vm14 = vsmask.f32 3328  ;;  %vm1954_vm15 = vsmask.f32 7440 }
 0x162   : > { %2722 = vmatpush3.bf16.msra.mxu0 %v2963_v9  ;;  %2743 = vmatprep.subr.bf16.mxu1 %v3402_v4  ;;  %v2966_v9 = vld [vmem:[%s4321_s24] sm:$0xff]   ;;  %vm4129_vm13 = vmand %vm1868_vm10, %vm1869_vm11  ;;  %s3406_s26 = smov [#allocation20]   ;;  %p2911_p0 = scmp.eq.s32.totalorder %s3698_s4, 1 }
 0x163   : > { %2735 = vmatprep.subr.bf16.mxu0 %v3402_v4  ;;  %vm1955_vm0 = vmor %vm1953_vm14, %vm1954_vm15  ;;  %s2282_s8 = sshll.u32 %s3406_s26, 4  ;;  %s2283_s8 = int_to_ptr.vmem [resolvable:$true] %s2282_s8 }
 0x164   : > { %2732 = vmatmul.mubr.msk.bf16.vlgmr.msra.gmra.mrb[0].mxu1 %vm1029_vm4, %v1005_v10  ;;  %p3308_p12 = scmp.lt.s32.totalorder %s2283_s8, %s2283_s8 }
 0x165   : > { %2724 = vmatmul.mubr.msk.bf16.vlgmr.msra.gmra.mrb[0].mxu0 %vm1029_vm4, %v1005_v10  ;;  %2745 = vmatprep.mubr.msk.bf16.mxu1 %vm3403_vm3, %v3402_v4 }
 0x166   : > { %2736 = vmatpush3.bf16.msra.mxu0 %v2964_v11  ;;  %2739 = vmatprep.mubr.msk.bf16.mxu0 %vm3403_vm3, %v3402_v4 }
 0x167   : > { %2737 = vmatprep.subr.bf16.mxu0 %v3402_v4 }
 0x16a   : > { %2738 = vmatpush3.bf16.msra.mxu0 %v2965_v12 }
 0x16b   : > { %2749 = vmatprep.subr.bf16.mxu0 %v3402_v4 }
 0x16d   : > { %2740 = vmatmul.mubr.msk.bf16.vlgmr.msra.gmra.mrb[4].mxu0 %vm1029_vm4, %v1005_v10 }
 0x16e   : > { %2751 = vmatprep.mubr.msk.bf16.mxu0 %vm3403_vm3, %v3402_v4 }
 0x237   : > { %v1133_v15 = vpop.f32.mrb[0].mxu1 }
 0x238   : > { %v1134_v16 = vadd.f32 %v2607_v13, %v1133_v15  ;;  %v2733_v17 = vpop.f32.mrb[1].mxu1  ;;  %v1067_v18 = vpop.f32.mrb[0].mxu0 }
 0x239   : > { %v1136_v19 = vpop.f32.mrb[2].mxu1  ;;  %v1068_v20 = vadd.f32 %v2603_v14, %v1067_v18  ;;  %v2725_v21 = vpop.f32.mrb[1].mxu0 }
 0x23a   : > { %v1206_v22 = vpack.c.bf16 %v1134_v16, %v1134_v16  ;;  %v1137_v23 = vadd.f32 %v2607_v13, %v1136_v19  ;;  %v2734_v24 = vpop.f32.mrb[3].mxu1  ;;  %v1070_v25 = vpop.f32.mrb[2].mxu0 }
 0x23b   : > { %v2726_v26 = vpop.f32.mrb[3].mxu0  ;;  %v1074_v29 = vmul.f32 0.25, %v1068_v20  ;;  %v1071_v30 = vadd.f32 %v2603_v14, %v1070_v25 }
 0x23c   : > { %v1222_v27 = vsel %vm1217_vm5, %v1206_v22, 0  ;;  %v1207_v28 = vpack.c.bf16 %v1137_v23, %v1137_v23 }
 0x23d   : > { %2744 = vmatpush3.bf16.xpose.msra.mxu1 %v1222_v27  ;;  %v1204_v33 = vpack.c.bf16 %v1074_v29, %v1074_v29  ;;  %v1075_v34 = vmul.f32 0.25, %v1071_v30 }
 0x23e   : > { %v1268_v31 = vsel %vm1217_vm5, %v1207_v28, 0  ;;  %2755 = vmatprep.subr.bf16.mxu1 %v3402_v4 }
 0x23f   : > { %2750 = vmatpush3.bf16.xpose.msra.mxu0 %v1268_v31  ;;  %v1205_v42 = vpack.c.bf16 %v1075_v34, %v1075_v34 }
 0x240   : > { %v1197_v35 = vpop.f32.mrb[4].mxu0  ;;  %2761 = vmatprep.subr.bf16.mxu0 %v3402_v4 }
 0x241   : > { %v1198_v36 = vadd.f32 %v2611_v32, %v1197_v35  ;;  %v2741_v37 = vpop.f32.mrb[5].mxu0 }
 0x242   : > { %v1200_v38 = vpop.f32.mrb[6].mxu0 }
 0x243   : > { %v4015_v39 = vpack.c.bf16 %v1198_v36, %v1198_v36  ;;  %v1201_v40 = vadd.f32 %v2611_v32, %v1200_v38  ;;  %v2742_v41 = vpop.f32.mrb[7].mxu0 }
 0x244   : > { %2746 = vmatmul.mubr.msk.bf16.vlgmr.msra.gmra.mrb[4].mxu1 %vm1217_vm5, %v1204_v33 }
 0x245   : > { %v1340_v43 = vsel %vm1338_vm6, %v4015_v39, 0  ;;  %v4020_v44 = vpack.c.bf16 %v1201_v40, %v1201_v40  ;;  %2757 = vmatprep.mubr.msk.bf16.mxu1 %vm3403_vm3, %v3402_v4 }
 0x246   : > { %2752 = vmatmul.mubr.msk.bf16.vlgmr.msra.gmra.mrb[8].mxu0 %vm1217_vm5, %v1205_v42  ;;  %2756 = vmatpush3.bf16.msra.mxu1 %v1340_v43 }
 0x247   : > { %v1386_v45 = vsel %vm1338_vm6, %v4020_v44, 0  ;;  %2763 = vmatprep.mubr.msk.bf16.mxu0 %vm3403_vm3, %v3402_v4  ;;  %2767 = vmatprep.subr.bf16.mxu1 %v3402_v4 }
 0x248   : > { %2762 = vmatpush3.bf16.msra.mxu0 %v1386_v45 }
 0x249   : > { %2773 = vmatprep.subr.bf16.mxu0 %v3402_v4 }
 0x317   : > { %v1258_v46 = vpop.f32.mrb[4].mxu1 }
 0x318   : > { %v2747_v47 = vpop.f32.mrb[5].mxu1  ;;  %v1311_v48 = vsel %vm1310_vm7, %v1258_v46, -inf }
 0x319   : > { %1312 = vmax.xlane.f32.xlu0 %v1311_v48  ;;  %v1261_v49 = vpop.f32.mrb[6].mxu1  ;;  %v1304_v50 = vpop.f32.mrb[8].mxu0 }
 0x31a   : > { %v2748_v51 = vpop.f32.mrb[7].mxu1  ;;  %v2753_v52 = vpop.f32.mrb[9].mxu0  ;;  %v1314_v55 = vsel %vm1310_vm7, %v1304_v50, -inf }
 0x31b   : > { %v1307_v53 = vpop.f32.mrb[10].mxu0 }
 0x31c   : > { %v2754_v54 = vpop.f32.mrb[11].mxu0 }
 0x31d   : > { %1315 = vmax.xlane.f32.xlu0 %v1314_v55 }
 0x333   : > { %1487 = vrot.lane.b32.xlu0 %v1206_v22, %s3404_s1 }
 0x3a6   : > { %v1313_v56 = vpop.xlane.xlu0 %1312 }
 0x3a7   : > { %v1317_v57 = vsub.f32 %v1258_v46, %v1313_v56 }
 0x3a9   : > { %v1319_v58 = vmul.f32 1.442695, %v1317_v57 }
 0x3aa   : > { %v1316_v59 = vpop.xlane.xlu0 %1315 }
 0x3ab   : > { %2979 = vpow2.f32 %v1319_v58  ;;  %v1318_v60 = vsub.f32 %v1304_v50, %v1316_v59 }
 0x3ad   : > { %v1321_v61 = vmul.f32 1.442695, %v1318_v60 }
 0x3ae   : > { %v1488_v13 = vpop.permute.xlu0 %1487 }
 0x3af   : > { %2981 = vpow2.f32 %v1321_v61  ;;  %v1493_v15 = vsel %vm1217_vm5, %v1488_v13, 0 }
 0x3b5   : > { %v2980_v62 = vpop.eup %2979 }
 0x3b6   : > { %v1323_v63 = vsel %vm1310_vm7, %v2980_v62, 0.0 }
 0x3b7   : > { %1324 = vadd.xlane.f32.xlu1 %v1323_v63 }
 0x3b9   : > { %v2982_v0 = vpop.eup %2981 }
 0x3ba   : > { %v1326_v1 = vsel %vm1310_vm7, %v2982_v0, 0.0 }
 0x3bb   : > { %1327 = vadd.xlane.f32.xlu1 %v1326_v1  ;;  %v2967_v1 = vld [vmem:[%s4322_s23 + $0x8] sm:$0xff]  }
 0x3cc   : > { %1539 = vrot.lane.b32.xlu1 %v1207_v28, %s3404_s1 }
 0x3d0   : > { %1484 = vrot.lane.b32.xlu1 %v1204_v33, %s3404_s1 }
 0x3d4   : > { %1536 = vrot.lane.b32.xlu1 %v1205_v42, %s3404_s1 }
 0x444   : > { %v1325_v2 = vpop.xlane.xlu1 %1324 }
 0x445   : > { %2983 = vrcp.f32 %v1325_v2 }
 0x448   : > { %v1328_v3 = vpop.xlane.xlu1 %1327 }
 0x449   : > { %2985 = vrcp.f32 %v1328_v3 }
 0x44c   : > { %v1540_v16 = vpop.permute.xlu1 %1539 }
 0x44d   : > { %v1545_v26 = vsel %vm1217_vm5, %v1540_v16, 0 }
 0x44f   : > { %v2984_v5 = vpop.eup %2983 }
 0x450   : > { %v1331_v6 = vmul.f32 %v2984_v5, %v2980_v62  ;;  %v1485_v17 = vpop.permute.xlu1 %1484 }
 0x452   : > { %v1333_v10 = vpack.c.bf16 %v1331_v6, %v1331_v6 }
 0x453   : > { %v2986_v11 = vpop.eup %2985 }
 0x454   : > { %v1332_v12 = vmul.f32 %v2986_v11, %v2982_v0  ;;  %2758 = vmatmul.mubr.msk.bf16.vlgmr.msra.gmra.mrb[8].mxu1 %vm1310_vm7, %v1333_v10  ;;  %v1537_v31 = vpop.permute.xlu1 %1536 }
 0x455   : > { %2768 = vmatpush3.bf16.msra.mxu1 %v2966_v9  ;;  %2769 = vmatprep.mubr.msk.bf16.mxu1 %vm3403_vm3, %v3402_v4 }
 0x456   : > { %v1334_v14 = vpack.c.bf16 %v1332_v12, %v1332_v12  ;;  %2779 = vmatprep.subr.bf16.mxu1 %v3402_v4 }
 0x458   : > { %2764 = vmatmul.mubr.msk.bf16.vlgmr.msra.gmra.mrb[12].mxu0 %vm1310_vm7, %v1334_v14  ;;  %v3405_v14 = vmov 0  }
 0x459   : > { %2774 = vmatpush3.bf16.xpose.msra.mxu0 %v1493_v15  ;;  %2775 = vmatprep.mubr.msk.bf16.mxu0 %vm3403_vm3, %v3402_v4  ;;  %v2615_v15 = vld [vmem:[%s4323_s19] ss:$0 sm:$0xff] }
 0x45a   : > { %2785 = vmatprep.subr.bf16.mxu0 %v3402_v4  ;;  %2959 = vset.pattern.permute.xlu1 %v3405_v14 }
 0x45b   : > { %2958 = vset.pattern.permute.xlu0 %v3405_v14  ;;  %v1877_v14 = vld [vmem:[#allocation2 + $0xc] sm:$0x1] }
 0x460   : > { %2776 = vmatmul.mubr.msk.bf16.vlgmr.msra.gmra.mrb[16].mxu0 %vm1217_vm5, %v1485_v17 }
 0x461   : > { %2787 = vmatprep.mubr.msk.bf16.mxu0 %vm3403_vm3, %v3402_v4 }
 0x527   : > { %v1376_v18 = vpop.f32.mrb[8].mxu1 }
 0x528   : > { %v2759_v19 = vpop.f32.mrb[9].mxu1 }
 0x529   : > { %v1379_v20 = vpop.f32.mrb[10].mxu1 }
 0x52a   : > { %v2760_v21 = vpop.f32.mrb[11].mxu1 }
 0x52b   : > { %v1422_v22 = vpop.f32.mrb[12].mxu0 }
 0x52c   : > { %v1428_v23 = vpack.c.bf16 %v1422_v22, %v1376_v18  ;;  %v2765_v24 = vpop.f32.mrb[13].mxu0 }
 0x52d   : > { %v1425_v25 = vpop.f32.mrb[14].mxu0 }
 0x52e   : > { %v2766_v27 = vpop.f32.mrb[15].mxu0  ;;  %2770 = vmatmul.mubr.msk.bf16.vlgmr.msra.gmra.mrb[12].mxu1 %vm1217_vm5, %v1428_v23 }
 0x52f   : > { %2780 = vmatpush3.bf16.xpose.msra.mxu1 %v1545_v26  ;;  %2781 = vmatprep.mubr.msk.bf16.mxu1 %vm3403_vm3, %v3402_v4 }
 0x530   : > { %2791 = vmatprep.subr.bf16.mxu1 %v3402_v4 }
 0x533   : > { %v1529_v28 = vpop.f32.mrb[16].mxu0 }
 0x534   : > { %v2777_v29 = vpop.f32.mrb[17].mxu0  ;;  %v1587_v30 = vsel %vm1310_vm7, %v1529_v28, -inf }
 0x535   : > { %1588 = vmax.xlane.f32.xlu0 %v1587_v30  ;;  %v1532_v32 = vpop.f32.mrb[18].mxu0 }
 0x536   : > { %v2778_v33 = vpop.f32.mrb[19].mxu0  ;;  %2782 = vmatmul.mubr.msk.bf16.vlgmr.msra.gmra.mrb[16].mxu1 %vm1217_vm5, %v1537_v31  ;;  %v1003_v31 = vld [vmem:[%s4324_s6] sm:$0xff] }
 0x537   : > { %2793 = vmatprep.mubr.msk.bf16.mxu1 %vm3403_vm3, %v3402_v4  ;;  %v2968_v32 = vld [vmem:[%s3948_s10] sm:$0xff]   ;;  %v2969_v33 = vld [vmem:[%s3948_s10 + $0x8] sm:$0xff]  }
 0x5c2   : > { %v1589_v34 = vpop.xlane.xlu0 %1588 }
 0x5c3   : > { %v1593_v35 = vsub.f32 %v1529_v28, %v1589_v34  ;;  %v2975_v34 = vld [vmem:[%s3953_s29] sm:$0xff]  }
 0x5c5   : > { %v1595_v36 = vmul.f32 1.442695, %v1593_v35  ;;  %v2976_v35 = vld [vmem:[%s3953_s29 + $0x8] sm:$0xff]  }
 0x5c7   : > { %2987 = vpow2.f32 %v1595_v36 }
 0x5d1   : > { %v2988_v37 = vpop.eup %2987 }
 0x5d2   : > { %v1599_v38 = vsel %vm1310_vm7, %v2988_v37, 0.0 }
 0x5d3   : > { %1600 = vadd.xlane.f32.xlu0 %v1599_v38 }
 0x601   : > { %v1474_v40 = vpop.f32.mrb[12].mxu1 }
 0x602   : > { %v2771_v41 = vpop.f32.mrb[13].mxu1  ;;  %v1481_v16 = vadd.f32 %v2615_v15, %v1474_v40 }
 0x603   : > { %v1477_v42 = vpop.f32.mrb[14].mxu1 }
 0x604   : > { %v2772_v43 = vpop.f32.mrb[15].mxu1  ;;  %v1482_v18 = vadd.f32 %v2615_v15, %v1477_v42 }
 0x609   : > { %v1581_v45 = vpop.f32.mrb[16].mxu1 }
 0x60a   : > { %v2783_v46 = vpop.f32.mrb[17].mxu1  ;;  %v1590_v47 = vsel %vm1310_vm7, %v1581_v45, -inf }
 0x60b   : > { %1591 = vmax.xlane.f32.xlu1 %v1590_v47  ;;  %v1584_v48 = vpop.f32.mrb[18].mxu1 }
 0x60c   : > { %v2784_v49 = vpop.f32.mrb[19].mxu1 }
 0x61c   : > { %1661 = vrot.lane.b32.xlu1 %v4020_v44, %s3404_s1 }
 0x660   : > { %v1601_v57 = vpop.xlane.xlu0 %1600 }
 0x698   : > { %v1592_v50 = vpop.xlane.xlu1 %1591 }
 0x699   : > { %v1594_v51 = vsub.f32 %v1581_v45, %v1592_v50 }
 0x69b   : > { %v1597_v52 = vmul.f32 1.442695, %v1594_v51 }
 0x69c   : > { %v1662_v53 = vpop.permute.xlu1 %1661 }
 0x69d   : > { %2989 = vpow2.f32 %v1597_v52  ;;  %v1667_v54 = vsel %vm1338_vm6, %v1662_v53, 0 }
 0x69e   : > { %2792 = vmatpush3.bf16.msra.mxu1 %v1667_v54  ;;  %2991 = vrcp.f32 %v1601_v57  ;;  %v2630_v54 = vld [vmem:[%s4325_s2] ss:$0 sm:$0xff] }
 0x69f   : > { %2803 = vmatprep.subr.bf16.mxu1 %v3402_v4 }
 0x6a7   : > { %v2990_v55 = vpop.eup %2989 }
 0x6a8   : > { %v1602_v56 = vsel %vm1310_vm7, %v2990_v55, 0.0  ;;  %v2992_v44 = vpop.eup %2991 }
 0x6a9   : > { %1603 = vadd.xlane.f32.xlu0 %v1602_v56  ;;  %v1607_v59 = vmul.f32 %v2992_v44, %v2988_v37  ;;  %v2631_v44 = vld [vmem:[%s4326_s5] ss:$0 sm:$0xff] }
 0x6ab   : > { %v1609_v62 = vpack.c.bf16 %v1607_v59, %v1607_v59 }
 0x6bf   : > { %1612 = vrot.lane.b32.xlu0 %v4015_v39, %s3404_s1 }
 0x736   : > { %v1604_v58 = vpop.xlane.xlu0 %1603 }
 0x737   : > { %2993 = vrcp.f32 %v1604_v58 }
 0x73a   : > { %v1613_v60 = vpop.permute.xlu0 %1612 }
 0x73b   : > { %v1618_v61 = vsel %vm1338_vm6, %v1613_v60, 0 }
 0x73c   : > { %2786 = vmatpush3.bf16.msra.mxu0 %v1618_v61 }
 0x73d   : > { %2797 = vmatprep.subr.bf16.mxu0 %v3402_v4 }
 0x73f   : > { %2788 = vmatmul.mubr.msk.bf16.vlgmr.msra.gmra.mrb[20].mxu0 %vm1310_vm7, %v1609_v62 }
 0x740   : > { %2799 = vmatprep.mubr.msk.bf16.mxu0 %vm3403_vm3, %v3402_v4  ;;  %2798 = vmatpush3.bf16.msra.mxu0 %v2967_v1 }
 0x741   : > { %v2994_v39 = vpop.eup %2993  ;;  %2827 = vmatprep.subr.bf16.mxu0 %v3402_v4 }
 0x742   : > { %v1608_v63 = vmul.f32 %v2994_v39, %v2990_v55 }
 0x744   : > { %v1610_v0 = vpack.c.bf16 %v1608_v63, %v1608_v63 }
 0x746   : > { %2794 = vmatmul.mubr.msk.bf16.vlgmr.msra.gmra.mrb[20].mxu1 %vm1310_vm7, %v1610_v0 }
 0x747   : > { %2807 = vmatprep.mubr.msk.bf16.mxu1 %vm3403_vm3, %v3402_v4  ;;  %2804 = vmatpush3.bf16.msra.mxu1 %v2968_v32 }
 0x748   : > { %2805 = vmatprep.subr.bf16.mxu1 %v3402_v4 }
 0x74b   : > { %2806 = vmatpush3.bf16.msra.mxu1 %v2969_v33 }
 0x74c   : > { %2811 = vmatprep.subr.bf16.mxu1 %v3402_v4 }
 0x812   : > { %v1654_v2 = vpop.f32.mrb[20].mxu0 }
 0x813   : > { %v2789_v3 = vpop.f32.mrb[21].mxu0 }
 0x814   : > { %v1657_v5 = vpop.f32.mrb[22].mxu0 }
 0x815   : > { %v2790_v6 = vpop.f32.mrb[23].mxu0 }
 0x819   : > { %v1703_v9 = vpop.f32.mrb[20].mxu1 }
 0x81a   : > { %v1709_v10 = vpack.c.bf16 %v1703_v9, %v1654_v2  ;;  %v2795_v11 = vpop.f32.mrb[21].mxu1 }
 0x81b   : > { %v1706_v12 = vpop.f32.mrb[22].mxu1 }
 0x81c   : > { %v2796_v13 = vpop.f32.mrb[23].mxu1  ;;  %2800 = vmatmul.mubr.msk.bf16.vlgmr.msra.gmra.mrb[24].mxu0 %vm1217_vm5, %v1709_v10  ;;  %vm2058_vm5 = vmor %vm2056_vm1, %vm2057_vm2 }
 0x81d   : > { %2835 = vmatprep.mubr.msk.bf16.mxu0 %vm3403_vm3, %v3402_v4  ;;  %2828 = vmatpush3.bf16.msra.mxu0 %v2975_v34  ;;  %v1874_v13 = vld [vmem:[#allocation2 + $0x8] sm:$0xf] }
 0x81e   : > { %2829 = vmatprep.subr.bf16.mxu0 %v3402_v4 }
 0x821   : > { %2830 = vmatpush3.bf16.msra.mxu0 %v2976_v35 }
 0x822   : > { %2831 = vmatprep.subr.bf16.mxu0 %v3402_v4 }
 0x8ef   : > { %v1756_v17 = vpop.f32.mrb[24].mxu0 }
 0x8f0   : > { %v1763_v19 = vadd.f32 %v1756_v17, %v1481_v16  ;;  %v2801_v20 = vpop.f32.mrb[25].mxu0 }
 0x8f1   : > { %v1759_v21 = vpop.f32.mrb[26].mxu0  ;;  %v1871_v20 = vld [vmem:[#allocation2 + $0x4] sm:$0x1] }
 0x8f2   : > { %v1765_v22 = vadd.f32 %v1763_v19, %v3975_v7  ;;  %v1764_v23 = vadd.f32 %v1759_v21, %v1482_v18  ;;  %v2802_v24 = vpop.f32.mrb[27].mxu0  ;;  %v1865_v19 = vld [vmem:[#allocation2] sm:$0xf] }
 0x8f4   : > { %v1766_v25 = vadd.f32 %v1764_v23, %v3977_v8  ;;  %v1767_v26 = vsel %vm1029_vm4, %v1765_v22, 0.0  ;;  %v1773_v29 = vmul.f32 %v1765_v22, %v1765_v22  ;;  %v1004_v8 = vld [vmem:[%s4324_s6 + $0x8] sm:$0xff] }
 0x8f5   : > { %1768 = vadd.xlane.f32.xlu1 %v1767_v26 }
 0x8f6   : > { %v1770_v27 = vsel %vm1029_vm4, %v1766_v25, 0.0  ;;  %v1774_v28 = vmul.f32 %v1766_v25, %v1766_v25  ;;  %v1775_v7 = vsel %vm1029_vm4, %v1773_v29, 0.0 }
 0x8f7   : > { %1771 = vadd.xlane.f32.xlu0 %v1770_v27 }
 0x8f8   : > { %v1778_v30 = vsel %vm1029_vm4, %v1774_v28, 0.0  ;;  %v2971_v28 = vld [vmem:[%s3948_s10 + $0x10] sm:$0xff]  }
 0x8f9   : > { %1779 = vadd.xlane.f32.xlu1 %v1778_v30 }
 0x8fb   : > { %1776 = vadd.xlane.f32.xlu0 %v1775_v7 }
 0x90a   : > { %1822 = vperm.xlu1 %2959, %v1004_v8  }
 0x911   : > { %1817 = vperm.xlu0 %2958, %v1003_v31  }
 0x982   : > { %v1769_v36 = vpop.xlane.xlu1 %1768 }
 0x983   : > { %v1781_v38 = vmul.f32 0.03125, %v1769_v36 }
 0x984   : > { %v1772_v37 = vpop.xlane.xlu0 %1771 }
 0x985   : > { %v1782_v40 = vmul.f32 0.03125, %v1772_v37  ;;  %v1785_v46 = vmul.f32 %v1781_v38, %v1781_v38  ;;  %v1789_v55 = vsub.f32 %v1765_v22, %v1781_v38  ;;  %v2972_v37 = vld [vmem:[%s3948_s10 + $0x18] sm:$0xff]  }
 0x986   : > { %v1780_v41 = vpop.xlane.xlu1 %1779 }
 0x987   : > { %v1786_v42 = vmul.f32 %v1782_v40, %v1782_v40  ;;  %v1784_v43 = vmul.f32 0.03125, %v1780_v41  ;;  %v1790_v52 = vsub.f32 %v1766_v25, %v1782_v40 }
 0x988   : > { %v1777_v45 = vpop.xlane.xlu0 %1776 }
 0x989   : > { %v1788_v47 = vsub.f32 %v1784_v43, %v1786_v42  ;;  %v1783_v48 = vmul.f32 0.03125, %v1777_v45 }
 0x98a   : > { %v4111_v60 = vpop.permute.xlu1 %1822 }
 0x98b   : > { %v1792_v49 = vadd.f32 1e-05, %v1788_v47  ;;  %v1787_v50 = vsub.f32 %v1783_v48, %v1785_v46 }
 0x98d   : > { %2995 = vrsqrt.f32 %v1792_v49  ;;  %v1791_v51 = vadd.f32 1e-05, %v1787_v50 }
 0x98f   : > { %2997 = vrsqrt.f32 %v1791_v51 }
 0x990   : > { %v4113_v39 = vpop.permute.xlu0 %1817 }
 0x997   : > { %v2996_v53 = vpop.eup %2995 }
 0x998   : > { %v1796_v56 = vmul.f32 %v2996_v53, %v1790_v52  ;;  %v2973_v52 = vld [vmem:[%s3948_s10 + $0x20] sm:$0xff]  }
 0x999   : > { %v2998_v57 = vpop.eup %2997 }
 0x99a   : > { %v1805_v58 = vmul.f32 %v2630_v54, %v1796_v56  ;;  %v1795_v59 = vmul.f32 %v2998_v57, %v1789_v55  ;;  %v2974_v55 = vld [vmem:[%s3948_s10 + $0x28] sm:$0xff]   ;;  %s4331_s10 = scalar_lea.vmem [#allocation18], %s3890_s16 }
 0x99c   : > { %v1814_v61 = vadd.f32 %v2631_v44, %v1805_v58  ;;  %v1804_v62 = vmul.f32 %v2630_v54, %v1795_v59 }
 0x99e   : > { %v4116_v63 = vmul.f32 %v4111_v60, %v1814_v61  ;;  %v1813_v0 = vadd.f32 %v2631_v44, %v1804_v62 }
 0x9a0   : > { %v2675_v1 = vpack.c.bf16 %v4116_v63, %v4116_v63  ;;  %v4121_v2 = vmul.f32 %v4113_v39, %v1813_v0 }
 0x9a2   : > { %v1851_v3 = vshrl.u32 %v2675_v1, 16  ;;  %v2674_v5 = vpack.c.bf16 %v4121_v2, %v4121_v2  ;;  %v1854_v10 = vshll.u32 %v2675_v1, 16  ;;  %v2977_v1 = vld [vmem:[%s3953_s29 + $0x10] sm:$0xff]  }
 0x9a3   : > { %2832 = vmatpush3.bf16.msra.mxu0 %v2977_v1 }
 0x9a4   : > { %v1853_v9 = vrot.slane %v1851_v3, 7  ;;  %v1843_v11 = vshrl.u32 %v2674_v5, 16  ;;  %v1846_v18 = vshll.u32 %v2674_v5, 16  ;;  %2833 = vmatprep.subr.bf16.mxu0 %v3402_v4  ;;  %v2978_v3 = vld [vmem:[%s3953_s29 + $0x18] sm:$0xff]   ;;  %v2632_v5 = vld [vmem:[%s4331_s10] ss:$0 sm:$0xff] }
 0x9a6   : > { %v1856_v15 = vor.u32 %v1854_v10, %v1853_v9  ;;  %v1857_v16 = vrot.slane %v1853_v9, 4  ;;  %v1845_v17 = vrot.slane %v1843_v11, 7 }
 0x9a7   : > { %2834 = vmatpush3.bf16.msra.mxu0 %v2978_v3 }
 0x9a8   : > { %v1875_v21 = vsel %vm4125_vm12, %v1856_v15, %v1874_v13  ;;  %v1878_v22 = vsel %vm4129_vm13, %v1857_v16, %v1877_v14  ;;  %v1848_v23 = vor.u32 %v1846_v18, %v1845_v17  ;;  %v1849_v24 = vrot.slane %v1845_v17, 4 }
 0x9a9   : > { %1876 = vst [vmem:[#allocation2 + $0x8] sm:$0xf] %v1875_v21  ;;  %1879 = vst [vmem:[#allocation2 + $0xc] sm:$0x1] %v1878_v22 }
 0x9aa   : > { %v1866_v25 = vsel %vm4125_vm12, %v1848_v23, %v1865_v19  ;;  %v1872_v26 = vsel %vm4129_vm13, %v1849_v24, %v1871_v20 }
 0x9ab   : > { %1867 = vst [vmem:[#allocation2] sm:$0xf] %v1866_v25  ;;  %1873 = vst [vmem:[#allocation2 + $0x4] sm:$0x1] %v1872_v26 }
 0x9b0   : > { %v1951_v27 = vld [vmem:[#allocation2 + $0x8] sm:$0xf]  ;;  %v1952_v36 = vld [vmem:[#allocation2 + $0xc] sm:$0x1] }
 0x9b1   : > { %v1971_v29 = vshrl.u32 %v1951_v27, 16  ;;  %v1974_v30 = vshll.u32 %v1951_v27, 16  ;;  %v1980_v45 = vshll.u32 %v1952_v36, 16  ;;  %v2051_v56 = vld [vmem:[#allocation2 + $0x8] sm:$0xe]  ;;  %v2065_v59 = vrot.slane %v1952_v36, 5 }
 0x9b2   : > { %v2970_v7 = vld [vmem:[#allocation2] ss:$8 sps:$4 sm:$0xff]   ;;  %v1950_v31 = vld [vmem:[#allocation2 + $0x4] sm:$0x1]  ;;  %v2648_v58 = vrot.slane %v2051_v56, 9 }
 0x9b3   : > { %v1949_v8 = vld [vmem:[#allocation2] sm:$0xf]  ;;  %v1973_v34 = vrot.slane %v1971_v29, 4  ;;  %v1976_v35 = vrot.slane %v1974_v30, 5  ;;  %2808 = vmatmul.mubr.msk.bf16.vlgmr.msra.gmra.mrb[24].mxu1 %vm1029_vm4, %v2970_v7  ;;  %v1966_v41 = vshll.u32 %v1950_v31, 16  ;;  %v1982_v50 = vrot.slane %v1980_v45, 5 }
 0x9b4   : > { %v1957_v32 = vshrl.u32 %v1949_v8, 16  ;;  %v1960_v33 = vshll.u32 %v1949_v8, 16  ;;  %2812 = vmatpush3.bf16.msra.mxu1 %v2971_v28  ;;  %2815 = vmatprep.mubr.msk.bf16.mxu1 %vm3403_vm3, %v3402_v4  ;;  %v2050_v54 = vld [vmem:[#allocation2] sm:$0xe]  ;;  %v2061_v44 = vrot.slane %v1950_v31, 5  ;;  %v2066_v62 = vsel %vm2058_vm5, %v2648_v58, %v2065_v59 }
 0x9b5   : > { %v1977_v42 = vor.u32 %v1976_v35, %v1973_v34  ;;  %2813 = vmatprep.subr.bf16.mxu1 %v3402_v4  ;;  %v1968_v47 = vrot.slane %v1966_v41, 5  ;;  %v2647_v57 = vrot.slane %v2050_v54, 9  ;;  %v2663_v45 = vld [vmem:[%s981_s17] ss:$0 sm:$0xff] }
 0x9b6   : > { %v1959_v38 = vrot.slane %v1957_v32, 4  ;;  %v1962_v40 = vrot.slane %v1960_v33, 5 }
 0x9b7   : > { %v1978_v48 = vrot.slane %v1977_v42, 4  ;;  %v2062_v61 = vsel %vm2058_vm5, %v2647_v57, %v2061_v44 }
 0x9b8   : > { %v1963_v43 = vor.u32 %v1962_v40, %v1959_v38  ;;  %2814 = vmatpush3.bf16.msra.mxu1 %v2972_v37  ;;  %v2653_v0 = vcombine.low %v2062_v61, %v2066_v62 }
 0x9b9   : > { %2819 = vmatprep.subr.bf16.mxu1 %v3402_v4  ;;  %v1983_v51 = vsel %vm1955_vm0, %v1978_v48, %v1982_v50 }
 0x9ba   : > { %v1964_v46 = vrot.slane %v1963_v43, 4 }
 0x9bc   : > { %v1969_v49 = vsel %vm1955_vm0, %v1964_v46, %v1968_v47  ;;  %v2664_v47 = vld [vmem:[%s984_s11] ss:$0 sm:$0xff]  ;;  %s3301_s11 = scalar_lea.vmem %s2283_s8, 256 }
 0x9bd   : > { %v2643_v53 = vcombine.low %v1969_v49, %v1983_v51  ;;  %p3302_p6 = scmp.ne.s32.totalorder %s2283_s8, %s3301_s11  ;;  %p3309_p4 = scmp.lt.s32.totalorder %s3301_s11, %s3301_s11 }
 0x9bf   : > { %2816 = vmatmul.mubr.msk.bf16.vlgmr.msra.gmra.mrb[24].mxu1 %vm1029_vm4, %v2643_v53  ;;  %p3303_p9 = pnand %p3302_p6, %p2911_p0  ;;  %p3310_p2 = por %p3309_p4, %p3308_p12 }
 0x9c0   : > { %2820 = vmatpush3.bf16.msra.mxu1 %v2973_v52  ;;  %2823 = vmatprep.mubr.msk.bf16.mxu1 %vm3403_vm3, %v3402_v4  ;;  %vm2175_vm3 = vcmask 523264  }
 0x9c1   : > { %2821 = vmatprep.subr.bf16.mxu1 %v3402_v4  ;;  %v2657_v4 = vld [vmem:[%s978_s21] ss:$0 sm:$0xff]  ;;  %p3304_p1 = pneg %p3303_p9 }
 0x9c3   : > { %p3311_p10 = pnand %p3310_p2, %p3304_p1 }
 0x9c4   : > { %2822 = vmatpush3.bf16.msra.mxu1 %v2974_v55 }
 0x9cb   : > { %2824 = vmatmul.mubr.msk.bf16.vlgmr.msra.gmra.mrb[24].mxu1 %vm1029_vm4, %v2653_v0 }
 0xa9e   : > { %v2124_v6 = vpop.f32.mrb[24].mxu1 }
 0xa9f   : > { %v2839_v9 = vadd.f32 %v2632_v5, %v2124_v6  ;;  %v2825_v10 = vpop.f32.mrb[25].mxu1 }
 0xaa0   : > { %v2127_v11 = vpop.f32.mrb[26].mxu1 }
 0xaa1   : > { %v2840_v12 = vadd.f32 %v2632_v5, %v2127_v11  ;;  %v2826_v13 = vpop.f32.mrb[27].mxu1  ;;  %v2133_v14 = vmax.f32 %v2839_v9, 0.0 }
 0xaa3   : > { %v2134_v15 = vmax.f32 %v2840_v12, 0.0 }
 0xaa5   : > { %v2142_v16 = vpack.c.bf16 %v2134_v15, %v2133_v14 }
 0xaa7   : > { %2836 = vmatmul.mubr.msk.bf16.vlgmr.msra.gmra.mrb[28].mxu0 %vm2175_vm3, %v2142_v16 }
 0xb7a   : > { %v2213_v17 = vpop.f32.mrb[28].mxu0 }
 0xb7b   : > { %v2220_v18 = vadd.f32 %v2657_v4, %v2213_v17  ;;  %v2837_v19 = vpop.f32.mrb[29].mxu0 }
 0xb7c   : > { %v2216_v20 = vpop.f32.mrb[30].mxu0 }
 0xb7d   : > { %v2222_v21 = vadd.f32 %v2220_v18, %v4121_v2  ;;  %v2221_v22 = vadd.f32 %v2657_v4, %v2216_v20  ;;  %v2838_v23 = vpop.f32.mrb[31].mxu0 }
 0xb7f   : > { %v2223_v24 = vadd.f32 %v2221_v22, %v4116_v63  ;;  %v2224_v25 = vsel %vm1029_vm4, %v2222_v21, 0.0  ;;  %v2230_v26 = vmul.f32 %v2222_v21, %v2222_v21 }
 0xb80   : > { %2225 = vadd.xlane.f32.xlu1 %v2224_v25 }
 0xb81   : > { %v2227_v27 = vsel %vm1029_vm4, %v2223_v24, 0.0  ;;  %v2232_v28 = vsel %vm1029_vm4, %v2230_v26, 0.0  ;;  %v2231_v29 = vmul.f32 %v2223_v24, %v2223_v24 }
 0xb82   : > { %2228 = vadd.xlane.f32.xlu0 %v2227_v27 }
 0xb83   : > { %v2235_v30 = vsel %vm1029_vm4, %v2231_v29, 0.0 }
 0xb84   : > { %2233 = vadd.xlane.f32.xlu1 %v2232_v28 }
 0xb88   : > { %2236 = vadd.xlane.f32.xlu1 %v2235_v30 }
 0xc0d   : > { %v2226_v7 = vpop.xlane.xlu1 %2225 }
 0xc0e   : > { %v2238_v2 = vmul.f32 0.03125, %v2226_v7 }
 0xc0f   : > { %v2229_v8 = vpop.xlane.xlu0 %2228 }
 0xc10   : > { %v2242_v63 = vmul.f32 %v2238_v2, %v2238_v2  ;;  %v2239_v32 = vmul.f32 0.03125, %v2229_v8  ;;  %v2246_v42 = vsub.f32 %v2222_v21, %v2238_v2 }
 0xc11   : > { %v2234_v31 = vpop.xlane.xlu1 %2233 }
 0xc12   : > { %v2240_v33 = vmul.f32 0.03125, %v2234_v31  ;;  %v2243_v36 = vmul.f32 %v2239_v32, %v2239_v32  ;;  %v2247_v48 = vsub.f32 %v2223_v24, %v2239_v32 }
 0xc14   : > { %v2244_v34 = vsub.f32 %v2240_v33, %v2242_v63 }
 0xc15   : > { %v2237_v35 = vpop.xlane.xlu1 %2236 }
 0xc16   : > { %v2248_v37 = vadd.f32 1e-05, %v2244_v34  ;;  %v2241_v38 = vmul.f32 0.03125, %v2237_v35 }
 0xc18   : > { %2999 = vrsqrt.f32 %v2248_v37  ;;  %v2245_v40 = vsub.f32 %v2241_v38, %v2243_v36 }
 0xc1a   : > { %v2249_v41 = vadd.f32 1e-05, %v2245_v40 }
 0xc1c   : > { %3001 = vrsqrt.f32 %v2249_v41 }
 0xc22   : > { %v3000_v43 = vpop.eup %2999 }
 0xc23   : > { %v2252_v46 = vmul.f32 %v3000_v43, %v2246_v42 }
 0xc25   : > { %v2261_v49 = vmul.f32 %v2663_v45, %v2252_v46 }
 0xc26   : > { %v3002_v50 = vpop.eup %3001 }
 0xc27   : > { %v2253_v51 = vmul.f32 %v3002_v50, %v2247_v48  ;;  %v2270_v52 = vadd.f32 %v2664_v47, %v2261_v49 }
 0xc29   : > { %v2262_v53 = vmul.f32 %v2663_v45, %v2253_v51  ;;  %v2272_v54 = vmul.f32 %v2270_v52, %v4113_v39 }
 0xc2b   : > { %v2271_v55 = vadd.f32 %v2664_v47, %v2262_v53  ;;  %2274 = vst.msk [vmem:[#allocation20] sm:$0xff] %vm1029_vm4, %v2272_v54 }
 0xc2d   : > { %v2273_v56 = vmul.f32 %v2271_v55, %v4111_v60 }
 0xc2f   : > { %2275 = vst.msk [vmem:[#allocation20 + $0x8] sm:$0xff] %vm1029_vm4, %v2273_v56 }
 0xc30   : > { %3314 = shalt.err (!%p3311_p10)
}
 0xc31   : > { %s4335_s1 = sld [smem:[#allocation47_spill]] }
 0xc37   : > { %s3315_s24 = scalar_lea.hbm %s4335_s1, 256 }
 0xc38   : > { %p3316_p7 = scmp.ne.s32.totalorder %s4335_s1, %s3315_s24  ;;  %p3321_p13 = scmp.lt.u32.totalorder %s3315_s24, %s4335_s1 }
 0xc3a   : > { %p3317_p5 = pnand %p3316_p7, %p2911_p0 }
 0xc3c   : > { %p3318_p3 = pneg %p3317_p5 }
 0xc3e   : > { %p3323_p11 = pnand %p3321_p13, %p3318_p3 }
 0xc40   : > { %3326 = shalt.err (!%p3323_p11)
}
 0xc41   : > { %s3407_s20 = smov 128   ;;  %s3408_s27 = smov 8  }
 0xc42   : > { %2873 = dma.vmem_to_hbm [thread:$0]  (%p2911_p0), %s2283_s8, 256, %s4335_s1, [#allocation5], %s3407_s20, %s3407_s20, %s3408_s27  }
 0xc43   : > { %3368 = dma.done.wait (%p2911_p0), [#allocation5], 256  }
 0xc44   : > { %3370 = vsyncadd (%p2911_p0), [#allocation5], 4294967040 }
 0xc45 PF: > { %s4336_s30 = sld [smem:[#allocation29_spill]]  ;;  %s4337_s10 = sld [smem:[#allocation28_spill]] }
 0xc46   : > { %s4338_s29 = sld [smem:[#allocation30_spill]]  ;;  %s4339_s27 = smov %s3377_s28 }
 0xc4b   : > { %p42_p8 = scmp.ge.s32.totalorder %s4336_s30, 4   ;;  %s4340_s28 = smov %s4337_s10 }
 0xc4d   :  { %44 = sbr.rel (!%p42_p8) target bundleno = 31 (0x1f), region = 258 }
 0xc54   :  { %2298 = vsyncpa [#allocation4], 1 }
 0xc55   :  { %2300 = vsyncpa [#allocation4 + $0x1], 1 }
 0xc56   :  { %2301 = vsyncpa [#allocation7], 1 }
 0xc57   :  { %2303 = vsyncpa [#allocation7 + $0x1], 1 }
 0xc58   :  { %2304 = vsyncpa [#allocation10], 1 }
 0xc59   :  { %2306 = vsyncpa [#allocation10 + $0x1], 1 }
 0xc5a   :  { %2307 = vsyncpa [#allocation13], 1 }
 0xc5b   :  { %2309 = vsyncpa [#allocation13 + $0x1], 1 }
 0xc5c   :  { %2310 = vsyncpa [#allocation16], 1 }
 0xc5d   :  { %2312 = vsyncpa [#allocation16 + $0x1], 1 }
 0xc5e   :  { %2313 = vsyncpa [#allocation19], 1 }
 0xc5f   :  { %2315 = vsyncpa [#allocation19 + $0x1], 1 }
 0xc60   :  { %2316 = vsyncpa [#allocation5], 1 }
 0xc61   :  { %2318 = vsyncpa [#allocation5 + $0x1], 1 }

</bundles_post_ra>
